<compile_context>
chip_gen: v5e
topology: v5e:2x2
jax: 0.10.0
libtpu: 0.0.40
codegen_flags: <defaults>
</compile_context>

<pallas_src>
import functools
import math
import re

import jax
import jax.numpy as jnp
from jax.experimental import pallas as pl
from jax.experimental.pallas import tpu as pltpu

LANES = 128


def _cdiv(a, b):
    return -(-a // b)


def _round_up(n, m):
    return ((n + m - 1) // m) * m


def _tpu_generation():
    """Best-effort TPU generation from device_kind ('TPU v5 lite'->5, 'TPU7x'->7)."""
    try:
        kind = jax.devices()[0].device_kind.lower()
    except Exception:
        return 0
    m = re.search(r"(\d+)", kind)
    return int(m.group(1)) if m else 0


def _pick_inner_width(tw, target=1024):
    """Largest divisor of tw that is a multiple of 128 and <= target, so the live
    (H*ROWS, chunk) activation footprint stays small no matter how wide tw is."""
    if tw <= target:
        return tw
    best = LANES
    for d in range(1, tw // LANES + 1):
        w = LANES * d
        if tw % w == 0 and w <= target:
            best = w
    return best


def _flow_kernel(x_ref, a_ref, b_ref, w1_ref, b1_ref, w2_ref, b2_ref,
                 w3_ref, b3_ref, z_ref, ld_ref, *, inner_tw, n_chunks, act_dtype):
    rows = x_ref.shape[0]
    hr = w2_ref.shape[0]
    hidden = hr // rows

    w1 = w1_ref[...]          # (H*R, 1)   act dtype
    b1c = b1_ref[...]         # (H*R, 1)   act dtype
    w2 = w2_ref[...]          # (H*R, H*R) bf16
    b2c = b2_ref[...]         # (H*R, 1)   f32
    w3 = w3_ref[...]          # (R, H*R)   bf16
    b3 = b3_ref[0, 0]         # scalar     f32 (SMEM)

    def process(col):
        x = x_ref[:, pl.ds(col, inner_tw)]            # (R, itw)   f32
        a = a_ref[:, pl.ds(col, inner_tw)]            # (1|R, itw) f32
        bb = b_ref[:, pl.ds(col, inner_tw)]
        xa = x.astype(act_dtype)

        # Layer 1 (Linear(1,H)): sublane replication + VPU FMA; a K=R matmul
        # would fill <=1/16 (v5e) / 1/32 (v6e+) of the MXU array.
        h1 = jnp.tanh(jnp.tile(xa, (hidden, 1)) * w1 + b1c)         # (H*R, itw)

        # Layer 2 (Linear(H,H)): block-diagonal kron(W2, I_R) on the MXU,
        # bf16 operands, f32 accumulation; element axis is the MXU N dim.
        pre2 = jnp.dot(w2, h1.astype(w2.dtype),
                       preferred_element_type=jnp.float32) + b2c    # (H*R, itw) f32
        h2 = jnp.tanh(pre2.astype(act_dtype))                       # (H*R, itw)

        # Layer 3 (Linear(H,1)): kron(W3, I_R) on the MXU + scalar bias.
        h = jnp.dot(w3, h2.astype(w3.dtype),
                    preferred_element_type=jnp.float32) + b3        # (R, itw) f32

        # Flow math kept in f32 for output accuracy.
        s = jax.nn.sigmoid(bb * h)
        t = a * s
        z_ref[:, pl.ds(col, inner_tw)] = (x + t).astype(z_ref.dtype)
        # TODO(synk): log1p (+ clamp) would be numerically safer for arguments
        # near/below -1; kept log(1 + .) to mirror the torch module exactly.
        ld_ref[:, pl.ds(col, inner_tw)] = jnp.log(
            1.0 + t * bb * (1.0 - s)).astype(ld_ref.dtype)

    if n_chunks <= 8:
        # Short fixed trip count: fully unrolled, static slices, LLO-visible.
        for j in range(n_chunks):
            process(j * inner_tw)
    else:
        def body(j, carry):
            process(pl.multiple_of(j * inner_tw, LANES))
            return carry
        jax.lax.fori_loop(0, n_chunks, body, 0)


def sigmoidal_flow(x, a, b, W1, b1, W2, b2, W3, b3, *,
                   target_tw=8192, rows=None, act_dtype=None):
    """x: (B, D) float32.  Params follow torch Linear conventions:
       W1 (H,1), b1 (H,), W2 (H,H), b2 (H,), W3 (1,H), b3 (1,)."""
    B, D = x.shape
    H = W2.shape[0]
    M = B * D

    # ---- generation-dependent knobs ------------------------------------------
    gen = _tpu_generation()
    legacy = 0 < gen <= 5                    # v5e & older: 128x128 MXU, no bf16 EUP
    if rows is None:
        rows = 8 if legacy else 16           # fill the 256x256 MXU on v6e/v7x
    if act_dtype is None:
        act_dtype = jnp.float32 if legacy else jnp.bfloat16  # bf16 tanh on v6e/v7x
    mxu_dtype = jnp.bfloat16                 # bf16 MXU operands everywhere (f32 acc)

    # ---- lane-tile width: multiple of lcm(128, D) so the a/b pattern repeats
    # ---- identically in every tile; large enough to amortize per-step overhead.
    period = (LANES * D) // math.gcd(LANES, D)        # lcm(128, D)
    small_period = period <= 4 * target_tw
    step = period if small_period else LANES
    needed_cols = _cdiv(M, rows)
    tw = min(_round_up(needed_cols, step), _round_up(target_tw, step))
    if needed_cols > step:
        # Guarantee >=2 grid steps so v7x's two TensorCores both get work.
        tw = min(tw, _round_up(_cdiv(needed_cols, 2), step))
    C = _round_up(needed_cols, tw)
    n_tiles = C // tw
    M_pad = rows * C

    # In-kernel lane chunking decouples the DMA tile (tw) from the live h1/h2
    # footprint (critical on v7x's 64 MiB VMEM).
    inner_tw = _pick_inner_width(tw, target=1024)
    n_chunks = tw // inner_tw

    # ---- element-axis layout: flat, zero-padded, reshaped to (rows, C) --------
    x2d = jnp.pad(x.reshape(-1), (0, M_pad - M)).reshape(rows, C)

    # ---- per-dim scale/shift: resident (1, tw) rows, not per-element maps -----
    if small_period:
        a_arr = jnp.tile(a, tw // D).reshape(1, tw)
        b_arr = jnp.tile(b, tw // D).reshape(1, tw)
        ab_spec = pl.BlockSpec((1, tw), lambda i: (0, 0))
    else:
        # TODO(synk): awkward D (lcm(128,D) too large) still streams full
        # per-element maps (3x the HBM read bytes); pad/choose D to avoid this.
        reps = _cdiv(M_pad, D)
        a_arr = jnp.tile(a, reps)[:M_pad].reshape(rows, C)
        b_arr = jnp.tile(b, reps)[:M_pad].reshape(rows, C)
        ab_spec = pl.BlockSpec((rows, tw), lambda i: (0, i))

    # ---- Kronecker-expanded MLP weights (hidden dim -> sublanes) --------------
    hr = H * rows
    eye = jnp.eye(rows, dtype=jnp.float32)
    w1_col = jnp.repeat(W1.reshape(H), rows).reshape(hr, 1).astype(act_dtype)
    b1_col = jnp.repeat(b1, rows).reshape(hr, 1).astype(act_dtype)
    W2b = jnp.kron(W2, eye).astype(mxu_dtype)                    # (hr, hr)
    b2_col = jnp.repeat(b2, rows).reshape(hr, 1)                 # f32
    W3b = jnp.kron(W3.reshape(1, H), eye).astype(mxu_dtype)      # (rows, hr)
    b3s = b3.reshape(1, 1)                                       # SMEM scalar

    slab_spec = pl.BlockSpec((rows, tw), lambda i: (0, i))

    def full(shape):
        return pl.BlockSpec(shape, lambda i: (0, 0))

    elems = rows * C
    cost = pl.CostEstimate(
        flops=int(2 * hr * hr * C + 2 * rows * hr * C + 2 * hr * C + 10 * elems),
        transcendentals=int((2 * H + 2) * elems),
        bytes_accessed=int(12 * elems
                           + (8 * tw * n_tiles if small_period else 8 * elems)
                           + n_tiles * (2 * hr * hr + 2 * rows * hr + 12 * hr + 4)),
    )

    kernel = functools.partial(_flow_kernel, inner_tw=inner_tw,
                               n_chunks=n_chunks, act_dtype=act_dtype)

    z2d, ld2d = pl.pallas_call(
        kernel,
        out_shape=(jax.ShapeDtypeStruct((rows, C), x.dtype),
                   jax.ShapeDtypeStruct((rows, C), x.dtype)),
        grid_spec=pltpu.PrefetchScalarGridSpec(
            num_scalar_prefetch=0,
            grid=(n_tiles,),
            in_specs=[
                slab_spec,                                          # x slab
                ab_spec,                                            # a (per-dim)
                ab_spec,                                            # b (per-dim)
                full((hr, 1)),                                      # W1 column
                full((hr, 1)),                                      # b1 expanded
                full((hr, hr)),                                     # kron(W2, I)
                full((hr, 1)),                                      # b2 expanded
                full((rows, hr)),                                   # kron(W3, I)
                pl.BlockSpec(memory_space=pltpu.MemorySpace.SMEM),  # b3 scalar
            ],
            out_specs=[slab_spec, slab_spec],
        ),
        compiler_params=pltpu.CompilerParams(
            dimension_semantics=("parallel",),
            vmem_limit_bytes=32 * 1024 * 1024),
        cost_estimate=cost,
    )(x2d, a_arr, b_arr, w1_col, b1_col, W2b, b2_col, W3b, b3s)

    z = z2d.reshape(-1)[:M].reshape(B, D)
    ld = ld2d.reshape(-1)[:M].reshape(B, D)
    return z, ld


def reference_forward(x, a, b, W1, b1, W2, b2, W3, b3):
    """Pure-JAX f32 transcription of the PyTorch forward."""
    x_in = x[..., None]                               # (B, D, 1)
    h1 = jnp.tanh(x_in @ W1.T + b1)                   # (B, D, H)
    h2 = jnp.tanh(h1 @ W2.T + b2)                     # (B, D, H)
    h = (h2 @ W3.T + b3)[..., 0]                      # (B, D)
    s = jax.nn.sigmoid(b * h)
    z = x + a * s
    ld = jnp.log(1.0 + a * b * s * (1.0 - s))
    return z, ld


if __name__ == "__main__":
    key = jax.random.PRNGKey(0)
    B, D, H = 2, 16, 16   # batch, input_dim, hidden_dim

    ks = jax.random.split(key, 9)
    x  = jax.random.normal(ks[0], (B, D), jnp.float32)
    a  = jax.random.normal(ks[1], (D,),   jnp.float32) * 0.5
    b  = jax.random.normal(ks[2], (D,),   jnp.float32) * 0.5
    W1 = jax.random.normal(ks[3], (H, 1), jnp.float32) * 0.5
    b1 = jax.random.normal(ks[4], (H,),   jnp.float32) * 0.1
    W2 = jax.random.normal(ks[5], (H, H), jnp.float32) * 0.5
    b2 = jax.random.normal(ks[6], (H,),   jnp.float32) * 0.1
    W3 = jax.random.normal(ks[7], (1, H), jnp.float32) * 0.5
    b3 = jax.random.normal(ks[8], (1,),   jnp.float32) * 0.1

    z, log_det = sigmoidal_flow(x, a, b, W1, b1, W2, b2, W3, b3)
    jax.block_until_ready((z, log_det))

    z_ref, ld_ref = reference_forward(x, a, b, W1, b1, W2, b2, W3, b3)
    assert z.shape == (B, D) and log_det.shape == (B, D)
    # Tolerances re-derived for bf16 MXU operands (and bf16 tanh on v6e/v7x);
    # this is not f32 bit-parity with the torch module.
    assert jnp.allclose(z, z_ref, atol=2e-2, rtol=2e-2), \
        float(jnp.max(jnp.abs(z - z_ref)))
    assert jnp.allclose(log_det, ld_ref, atol=2e-2, rtol=2e-2), \
        float(jnp.max(jnp.abs(log_det - ld_ref)))

    print("KERNEL_OK")
</pallas_src>

<mosaic_0001>
module attributes {stable_mosaic.version = 11 : i64} {
  func.func @_flow_kernel(%arg0: i32, %arg1: memref<16x128xf32, #tpu.memory_space<vmem>>, %arg2: memref<1x128xf32, #tpu.memory_space<vmem>>, %arg3: memref<1x128xf32, #tpu.memory_space<vmem>>, %arg4: memref<256x1xbf16, #tpu.memory_space<vmem>>, %arg5: memref<256x1xbf16, #tpu.memory_space<vmem>>, %arg6: memref<256x256xbf16, #tpu.memory_space<vmem>>, %arg7: memref<256x1xf32, #tpu.memory_space<vmem>>, %arg8: memref<16x256xbf16, #tpu.memory_space<vmem>>, %arg9: memref<1x1xf32, #tpu.memory_space<smem>>, %arg10: memref<16x128xf32, #tpu.memory_space<vmem>>, %arg11: memref<16x128xf32, #tpu.memory_space<vmem>>) attributes {dimension_semantics = [#tpu.dimension_semantics<parallel>], iteration_bounds = array<i64: 1>, scalar_prefetch = 0 : i64, scratch_operands = 0 : i64, tpu.core_type = #tpu.core_type<tc>, window_params = [{transform_indices = @transform_0, window_bounds = array<i64: 16, 128>}, {pipeline_mode = #tpu.pipeline_mode<synchronous>, transform_indices = @transform_1, window_bounds = array<i64: 1, 128>}, {pipeline_mode = #tpu.pipeline_mode<synchronous>, transform_indices = @transform_2, window_bounds = array<i64: 1, 128>}, {pipeline_mode = #tpu.pipeline_mode<synchronous>, transform_indices = @transform_3, window_bounds = array<i64: 256, 1>}, {pipeline_mode = #tpu.pipeline_mode<synchronous>, transform_indices = @transform_4, window_bounds = array<i64: 256, 1>}, {pipeline_mode = #tpu.pipeline_mode<synchronous>, transform_indices = @transform_5, window_bounds = array<i64: 256, 256>}, {pipeline_mode = #tpu.pipeline_mode<synchronous>, transform_indices = @transform_6, window_bounds = array<i64: 256, 1>}, {pipeline_mode = #tpu.pipeline_mode<synchronous>, transform_indices = @transform_7, window_bounds = array<i64: 16, 256>}, {transform_indices = @transform_8, window_bounds = array<i64: 1, 1>}, {transform_indices = @transform_9, window_bounds = array<i64: 16, 128>}, {transform_indices = @transform_10, window_bounds = array<i64: 16, 128>}]} {
    %c0 = arith.constant 0 : index
    %c0_0 = arith.constant 0 : index
    %0 = vector.load %arg4[%c0, %c0_0] : memref<256x1xbf16, #tpu.memory_space<vmem>>, vector<256x1xbf16>
    %c0_1 = arith.constant 0 : index
    %c0_2 = arith.constant 0 : index
    %1 = vector.load %arg5[%c0_1, %c0_2] : memref<256x1xbf16, #tpu.memory_space<vmem>>, vector<256x1xbf16>
    %c0_3 = arith.constant 0 : index
    %c0_4 = arith.constant 0 : index
    %2 = vector.load %arg6[%c0_3, %c0_4] : memref<256x256xbf16, #tpu.memory_space<vmem>>, vector<256x256xbf16>
    %c0_5 = arith.constant 0 : index
    %c0_6 = arith.constant 0 : index
    %3 = vector.load %arg7[%c0_5, %c0_6] : memref<256x1xf32, #tpu.memory_space<vmem>>, vector<256x1xf32>
    %c0_7 = arith.constant 0 : index
    %c0_8 = arith.constant 0 : index
    %4 = vector.load %arg8[%c0_7, %c0_8] : memref<16x256xbf16, #tpu.memory_space<vmem>>, vector<16x256xbf16>
    %c0_9 = arith.constant 0 : index
    %c0_10 = arith.constant 0 : index
    %5 = memref.load %arg9[%c0_9, %c0_10] : memref<1x1xf32, #tpu.memory_space<smem>>
    %c0_11 = arith.constant 0 : index
    %c0_12 = arith.constant 0 : index
    %6 = vector.load %arg1[%c0_11, %c0_12] : memref<16x128xf32, #tpu.memory_space<vmem>>, vector<16x128xf32>
    %c0_13 = arith.constant 0 : index
    %c0_14 = arith.constant 0 : index
    %7 = vector.load %arg2[%c0_13, %c0_14] : memref<1x128xf32, #tpu.memory_space<vmem>>, vector<1x128xf32>
    %c0_15 = arith.constant 0 : index
    %c0_16 = arith.constant 0 : index
    %8 = vector.load %arg3[%c0_15, %c0_16] : memref<1x128xf32, #tpu.memory_space<vmem>>, vector<1x128xf32>
    %9 = arith.truncf %6 : vector<16x128xf32> to vector<16x128xbf16>
    %10 = tpu.concatenate %9, %9, %9, %9, %9, %9, %9, %9, %9, %9, %9, %9, %9, %9, %9, %9 in 0 : vector<16x128xbf16>, vector<16x128xbf16>, vector<16x128xbf16>, vector<16x128xbf16>, vector<16x128xbf16>, vector<16x128xbf16>, vector<16x128xbf16>, vector<16x128xbf16>, vector<16x128xbf16>, vector<16x128xbf16>, vector<16x128xbf16>, vector<16x128xbf16>, vector<16x128xbf16>, vector<16x128xbf16>, vector<16x128xbf16>, vector<16x128xbf16> -> vector<256x128xbf16>
    %11 = vector.broadcast %0 : vector<256x1xbf16> to vector<256x128xbf16>
    %12 = arith.mulf %10, %11 : vector<256x128xbf16>
    %13 = vector.broadcast %1 : vector<256x1xbf16> to vector<256x128xbf16>
    %14 = arith.addf %12, %13 : vector<256x128xbf16>
    %15 = math.tanh %14 : vector<256x128xbf16>
    %cst = arith.constant dense<0.000000e+00> : vector<256x128xf32>
    %16 = tpu.matmul %2, %15, %cst {dimension_numbers = #tpu.dot_dimension_numbers<[1], [0], [0], [1], [0, 0, 1, 1], [], []>} : vector<256x256xbf16>, vector<256x128xbf16>, vector<256x128xf32> -> vector<256x128xf32>
    %17 = vector.broadcast %3 : vector<256x1xf32> to vector<256x128xf32>
    %18 = arith.addf %16, %17 : vector<256x128xf32>
    %19 = arith.truncf %18 : vector<256x128xf32> to vector<256x128xbf16>
    %20 = math.tanh %19 : vector<256x128xbf16>
    %cst_17 = arith.constant dense<0.000000e+00> : vector<16x128xf32>
    %21 = tpu.matmul %4, %20, %cst_17 {dimension_numbers = #tpu.dot_dimension_numbers<[1], [0], [0], [1], [0, 0, 1, 1], [], []>} : vector<16x256xbf16>, vector<256x128xbf16>, vector<16x128xf32> -> vector<16x128xf32>
    %22 = vector.broadcast %5 : f32 to vector<16x128xf32>
    %23 = arith.addf %21, %22 : vector<16x128xf32>
    %24 = vector.broadcast %8 : vector<1x128xf32> to vector<16x128xf32>
    %25 = arith.mulf %24, %23 : vector<16x128xf32>
    %26 = arith.negf %25 : vector<16x128xf32>
    %27 = math.exp %26 : vector<16x128xf32>
    %cst_18 = arith.constant 1.000000e+00 : f32
    %28 = vector.broadcast %cst_18 : f32 to vector<16x128xf32>
    %29 = arith.addf %28, %27 : vector<16x128xf32>
    %30 = arith.divf %28, %29 : vector<16x128xf32>
    %31 = vector.broadcast %7 : vector<1x128xf32> to vector<16x128xf32>
    %32 = arith.mulf %31, %30 : vector<16x128xf32>
    %33 = arith.addf %6, %32 : vector<16x128xf32>
    %c0_19 = arith.constant 0 : index
    %c0_20 = arith.constant 0 : index
    %34 = vector.load %arg10[%c0_19, %c0_20] : memref<16x128xf32, #tpu.memory_space<vmem>>, vector<16x128xf32>
    tpu.vector_store %arg10[%c0_19, %c0_20], %33 {strides = array<i32>} : memref<16x128xf32, #tpu.memory_space<vmem>>, vector<16x128xf32>,
    %35 = vector.broadcast %8 : vector<1x128xf32> to vector<16x128xf32>
    %36 = arith.mulf %32, %35 : vector<16x128xf32>
    %cst_21 = arith.constant 1.000000e+00 : f32
    %37 = vector.broadcast %cst_21 : f32 to vector<16x128xf32>
    %38 = arith.subf %37, %30 : vector<16x128xf32>
    %39 = arith.mulf %36, %38 : vector<16x128xf32>
    %cst_22 = arith.constant 1.000000e+00 : f32
    %40 = vector.broadcast %cst_22 : f32 to vector<16x128xf32>
    %41 = arith.addf %40, %39 : vector<16x128xf32>
    %42 = math.log %41 : vector<16x128xf32>
    %c0_23 = arith.constant 0 : index
    %c0_24 = arith.constant 0 : index
    %43 = vector.load %arg11[%c0_23, %c0_24] : memref<16x128xf32, #tpu.memory_space<vmem>>, vector<16x128xf32>
    tpu.vector_store %arg11[%c0_23, %c0_24], %42 {strides = array<i32>} : memref<16x128xf32, #tpu.memory_space<vmem>>, vector<16x128xf32>,
    return
  }
  func.func @transform_0(%arg0: i32) -> (i32, i32) {
    %c0_i32 = arith.constant 0 : i32
    %c0_i32_0 = arith.constant 0 : i32
    return %c0_i32, %arg0 : i32, i32
  }
  func.func @transform_1(%arg0: i32) -> (i32, i32) {
    %c0_i32 = arith.constant 0 : i32
    %c0_i32_0 = arith.constant 0 : i32
    %c0_i32_1 = arith.constant 0 : i32
    return %c0_i32, %c0_i32_0 : i32, i32
  }
  func.func @transform_2(%arg0: i32) -> (i32, i32) {
    %c0_i32 = arith.constant 0 : i32
    %c0_i32_0 = arith.constant 0 : i32
    %c0_i32_1 = arith.constant 0 : i32
    return %c0_i32, %c0_i32_0 : i32, i32
  }
  func.func @transform_3(%arg0: i32) -> (i32, i32) {
    %c0_i32 = arith.constant 0 : i32
    %c0_i32_0 = arith.constant 0 : i32
    %c0_i32_1 = arith.constant 0 : i32
    return %c0_i32, %c0_i32_0 : i32, i32
  }
  func.func @transform_4(%arg0: i32) -> (i32, i32) {
    %c0_i32 = arith.constant 0 : i32
    %c0_i32_0 = arith.constant 0 : i32
    %c0_i32_1 = arith.constant 0 : i32
    return %c0_i32, %c0_i32_0 : i32, i32
  }
  func.func @transform_5(%arg0: i32) -> (i32, i32) {
    %c0_i32 = arith.constant 0 : i32
    %c0_i32_0 = arith.constant 0 : i32
    %c0_i32_1 = arith.constant 0 : i32
    return %c0_i32, %c0_i32_0 : i32, i32
  }
  func.func @transform_6(%arg0: i32) -> (i32, i32) {
    %c0_i32 = arith.constant 0 : i32
    %c0_i32_0 = arith.constant 0 : i32
    %c0_i32_1 = arith.constant 0 : i32
    return %c0_i32, %c0_i32_0 : i32, i32
  }
  func.func @transform_7(%arg0: i32) -> (i32, i32) {
    %c0_i32 = arith.constant 0 : i32
    %c0_i32_0 = arith.constant 0 : i32
    %c0_i32_1 = arith.constant 0 : i32
    return %c0_i32, %c0_i32_0 : i32, i32
  }
  func.func @transform_8(%arg0: i32) -> (i32, i32) {
    %c0_i32 = arith.constant 0 : i32
    %c0_i32_0 = arith.constant 0 : i32
    %c0_i32_1 = arith.constant 0 : i32
    return %c0_i32, %c0_i32_0 : i32, i32
  }
  func.func @transform_9(%arg0: i32) -> (i32, i32) {
    %c0_i32 = arith.constant 0 : i32
    %c0_i32_0 = arith.constant 0 : i32
    return %c0_i32, %arg0 : i32, i32
  }
  func.func @transform_10(%arg0: i32) -> (i32, i32) {
    %c0_i32 = arith.constant 0 : i32
    %c0_i32_0 = arith.constant 0 : i32
    return %c0_i32, %arg0 : i32, i32
  }
}

</mosaic_0001>

<bundles_post_ra>
// kernel: tpu_custom_call.1
= control target key start
LH: loop header
LB: loop body
LE: loop exit
PB: predicated region body
PF: predicated region fallthrough
CT: control target
= control target key end

     0   :  { %17 = vsyncpa [#allocation4], 0  ;;  %v2174_v2 = vmov 0   ;;  %s3052_s0 = inlined_call_operand.vmem [shape: f32[16,128], index: 0, kind: input, shape index: {}]   ;;  %s3053_s1 = inlined_call_operand.vmem [shape: f32[1,128], index: 1, kind: input, shape index: {}]   ;;  %s3054_s2 = inlined_call_operand.vmem [shape: f32[1,128], index: 2, kind: input, shape index: {}]   ;;  %s3055_s3 = inlined_call_operand.vmem [shape: bf16[256,1], index: 3, kind: input, shape index: {}]   ;;  %s3056_s4 = inlined_call_operand.vmem [shape: bf16[256,1], index: 4, kind: input, shape index: {}]   ;;  %s3057_s5 = inlined_call_operand.vmem [shape: bf16[256,256], index: 5, kind: input, shape index: {}]   ;;  %s3058_s6 = inlined_call_operand.vmem [shape: f32[256,1], index: 6, kind: input, shape index: {}]   ;;  %s3059_s7 = inlined_call_operand.vmem [shape: bf16[16,256], index: 7, kind: input, shape index: {}]   ;;  %s3060_s8 = inlined_call_operand.<no memory space> [shape: f32[1,1], index: 8, kind: input, shape index: {}]   ;;  %s3061_s9 = inlined_call_operand.hbm [shape: f32[16,128], index: 9, kind: output, shape index: {0}]   ;;  %s3062_s10 = inlined_call_operand.hbm [shape: f32[16,128], index: 10, kind: output, shape index: {1}]  }
   0x1   :  { %v67_v0 = vld [vmem:[%s3055_s3 + $0x78] sm:$0xf]  ;;  %1977 = vset.pattern.permute.xlu2 %v2174_v2  ;;  %1976 = vset.pattern.permute.xlu1 %v2174_v2  ;;  %v49_v3 = vld [vmem:[%s3055_s3 + $0x30] sm:$0xf] }
   0x2   :  { %v51_v1 = vld [vmem:[%s3055_s3 + $0x38] sm:$0xf]  ;;  %1975 = vset.pattern.permute.xlu0 %v2174_v2  ;;  %452 = vperm.xlu1 %1976, %v67_v0  }
   0x3   :  { %308 = vperm.xlu0 %1975, %v51_v1   ;;  %290 = vperm.xlu2 %1977, %v49_v3  }
   0x4   :  { %18 = vsyncpa [#allocation6], 0  ;;  %v68_v4 = vld [vmem:[%s3055_s3 + $0x7c] sm:$0xf]  ;;  %v50_v6 = vld [vmem:[%s3055_s3 + $0x34] sm:$0xf] }
   0x5   :  { %v52_v5 = vld [vmem:[%s3055_s3 + $0x3c] sm:$0xf]  ;;  %v66_v7 = vld [vmem:[%s3055_s3 + $0x74] sm:$0xf]  ;;  %v65_v8 = vld [vmem:[%s3055_s3 + $0x70] sm:$0xf] }
   0x6   :  { %v83_v9 = vld [vmem:[%s3056_s4 + $0x38] sm:$0xf]  ;;  %v47_v10 = vld [vmem:[%s3055_s3 + $0x28] sm:$0xf]  ;;  %v84_v11 = vld [vmem:[%s3056_s4 + $0x3c] sm:$0xf] }
   0x7   :  { %v48_v12 = vld [vmem:[%s3055_s3 + $0x2c] sm:$0xf]  ;;  %v100_v13 = vld [vmem:[%s3056_s4 + $0x7c] sm:$0xf]  ;;  %v99_v14 = vld [vmem:[%s3056_s4 + $0x78] sm:$0xf] }
   0x8   :  { %v63_v15 = vld [vmem:[%s3055_s3 + $0x68] sm:$0xf]  ;;  %v81_v16 = vld [vmem:[%s3056_s4 + $0x30] sm:$0xf]  ;;  %v64_v17 = vld [vmem:[%s3055_s3 + $0x6c] sm:$0xf] }
   0x9   :  { %v82_v18 = vld [vmem:[%s3056_s4 + $0x34] sm:$0xf]  ;;  %v46_v19 = vld [vmem:[%s3055_s3 + $0x24] sm:$0xf]  ;;  %v97_v20 = vld [vmem:[%s3056_s4 + $0x70] sm:$0xf] }
   0xa   :  { %461 = vperm.xlu1 %1976, %v68_v4   ;;  %v45_v21 = vld [vmem:[%s3055_s3 + $0x20] sm:$0xf]  ;;  %v62_v23 = vld [vmem:[%s3055_s3 + $0x64] sm:$0xf]  ;;  %v98_v24 = vld [vmem:[%s3056_s4 + $0x74] sm:$0xf] }
   0xb   :  { %317 = vperm.xlu0 %1975, %v52_v5   ;;  %299 = vperm.xlu2 %1977, %v50_v6   ;;  %v61_v22 = vld [vmem:[%s3055_s3 + $0x60] sm:$0xf]  ;;  %v80_v25 = vld [vmem:[%s3056_s4 + $0x2c] sm:$0xf]  ;;  %v79_v26 = vld [vmem:[%s3056_s4 + $0x28] sm:$0xf] }
   0xc   :  { %v43_v27 = vld [vmem:[%s3055_s3 + $0x18] sm:$0xf]  ;;  %v95_v28 = vld [vmem:[%s3056_s4 + $0x68] sm:$0xf]  ;;  %v44_v29 = vld [vmem:[%s3055_s3 + $0x1c] sm:$0xf] }
   0xd   :  { %v96_v30 = vld [vmem:[%s3056_s4 + $0x6c] sm:$0xf]  ;;  %v60_v31 = vld [vmem:[%s3055_s3 + $0x5c] sm:$0xf]  ;;  %v59_v32 = vld [vmem:[%s3055_s3 + $0x58] sm:$0xf] }
   0xe   :  { %v77_v33 = vld [vmem:[%s3056_s4 + $0x20] sm:$0xf]  ;;  %v41_v34 = vld [vmem:[%s3055_s3 + $0x10] sm:$0xf]  ;;  %v78_v35 = vld [vmem:[%s3056_s4 + $0x24] sm:$0xf] }
   0xf   :  { %v42_v36 = vld [vmem:[%s3055_s3 + $0x14] sm:$0xf]  ;;  %v94_v38 = vld [vmem:[%s3056_s4 + $0x64] sm:$0xf]  ;;  %v93_v39 = vld [vmem:[%s3056_s4 + $0x60] sm:$0xf] }
  0x10   :  { %v57_v40 = vld [vmem:[%s3055_s3 + $0x50] sm:$0xf]  ;;  %v75_v42 = vld [vmem:[%s3056_s4 + $0x18] sm:$0xf]  ;;  %v58_v43 = vld [vmem:[%s3055_s3 + $0x54] sm:$0xf] }
  0x11   :  { %v76_v44 = vld [vmem:[%s3056_s4 + $0x1c] sm:$0xf]  ;;  %v40_v46 = vld [vmem:[%s3055_s3 + $0xc] sm:$0xf]  ;;  %v91_v47 = vld [vmem:[%s3056_s4 + $0x58] sm:$0xf] }
  0x12   :  { %443 = vperm.xlu1 %1976, %v66_v7   ;;  %v39_v48 = vld [vmem:[%s3055_s3 + $0x8] sm:$0xf]  ;;  %v168_v49 = vld [vmem:[%s3052_s0] sm:$0xff]  ;;  %v2175_v56 = vmov 839922192   ;;  %s1751_s26 = sshll.u32 %s3061_s9, 4  ;;  %s1752_s26 = int_to_ptr.hbm [resolvable:$true] %s1751_s26 }
  0x13   :  { %434 = vperm.xlu0 %1975, %v65_v8   ;;  %694 = vperm.xlu2 %1977, %v83_v9   ;;  %v169_v50 = vld [vmem:[%s3052_s0 + $0x8] sm:$0xff]  ;;  %v172_v54 = vpack.c.bf16 %v168_v49, %v168_v49  ;;  %v186_v57 = vunpack.c.l.s4 %v2175_v56  ;;  %v92_v60 = vld [vmem:[%s3056_s4 + $0x5c] sm:$0xf]  ;;  %v74_v5 = vld [vmem:[%s3056_s4 + $0x14] sm:$0xf]  ;;  %s2177_s28 = smov 128  }
  0x14   :  { %v173_v55 = vpack.c.bf16 %v169_v50, %v169_v50  ;;  %v55_v58 = vld [vmem:[%s3055_s3 + $0x48] sm:$0xf]  ;;  %v56_v59 = vld [vmem:[%s3055_s3 + $0x4c] sm:$0xf]  ;;  %v73_v7 = vld [vmem:[%s3056_s4 + $0x10] sm:$0xf] }
  0x15   :  { %v176_v61 = vunpack.c.l.b16 %v172_v54  ;;  %v2391_v63 = vunpack.c.0.s8 %v186_v57  ;;  %v37_v8 = vld [vmem:[%s3055_s3] sm:$0xf]  ;;  %s2178_s29 = smov 8   ;;  %s2179_s9 = smov [#allocation5]  }
  0x16   :  { %v177_v62 = vunpack.c.l.b16 %v173_v55  ;;  %s1762_s30 = sshll.u32 %s2179_s9, 4  ;;  %s1763_s30 = int_to_ptr.vmem [resolvable:$true] %s1762_s30 }
  0x18   :  { %v178_v3 = vpack.c.b16 %v177_v62, %v176_v61  ;;  %v87_v62 = vld [vmem:[%s3056_s4 + $0x48] sm:$0xf] }
  0x1a   :  { %272 = vperm.xlu1 %1976, %v47_v10   ;;  %v2406_v9 = vunpack.c.l.bf16 %v178_v3 }
  0x1b   :  { %703 = vperm.xlu0 %1975, %v84_v11   ;;  %281 = vperm.xlu2 %1977, %v48_v12   ;;  %v2408_v11 = vunpack.c.h.bf16 %v178_v3  ;;  %v72_v3 = vld [vmem:[%s3056_s4 + $0xc] sm:$0xf] }
  0x22   :  { %847 = vperm.xlu1 %1976, %v100_v13  }
  0x23   :  { %838 = vperm.xlu0 %1975, %v99_v14   ;;  %416 = vperm.xlu2 %1977, %v63_v15  }
  0x2a   :  { %676 = vperm.xlu1 %1976, %v81_v16  }
  0x2b   :  { %425 = vperm.xlu0 %1975, %v64_v17   ;;  %685 = vperm.xlu2 %1977, %v82_v18   ;;  %v89_v18 = vld [vmem:[%s3056_s4 + $0x50] sm:$0xf] }
  0x32   :  { %263 = vperm.xlu1 %1976, %v46_v19  }
  0x33   :  { %820 = vperm.xlu2 %1977, %v97_v20   ;;  %254 = vperm.xlu0 %1975, %v45_v21   ;;  %v38_v21 = vld [vmem:[%s3055_s3 + $0x4] sm:$0xf] }
  0x3a   :  { %398 = vperm.xlu1 %1976, %v61_v22   ;;  %v90_v22 = vld [vmem:[%s3056_s4 + $0x54] sm:$0xf] }
  0x3b   :  { %407 = vperm.xlu2 %1977, %v62_v23   ;;  %829 = vperm.xlu0 %1975, %v98_v24  }
  0x42   :  { %667 = vperm.xlu1 %1976, %v80_v25  }
  0x43   :  { %658 = vperm.xlu0 %1975, %v79_v26   ;;  %236 = vperm.xlu2 %1977, %v43_v27  }
  0x4a   :  { %802 = vperm.xlu1 %1976, %v95_v28  }
  0x4b   :  { %245 = vperm.xlu0 %1975, %v44_v29   ;;  %811 = vperm.xlu2 %1977, %v96_v30  }
  0x52   :  { %389 = vperm.xlu1 %1976, %v60_v31  }
  0x53   :  { %380 = vperm.xlu0 %1975, %v59_v32   ;;  %640 = vperm.xlu2 %1977, %v77_v33  }
  0x5a   :  { %218 = vperm.xlu1 %1976, %v41_v34  }
  0x5b   :  { %649 = vperm.xlu0 %1975, %v78_v35   ;;  %227 = vperm.xlu2 %1977, %v42_v36  }
  0x5d   :  { %v2343_v37 = vpop.permute.xlu2 %290 }
  0x5e   :  { %v296_v34 = vperm.slane %v2343_v37, %v2391_v63  ;;  %v71_v37 = vld [vmem:[%s3056_s4 + $0x8] sm:$0xf] }
  0x62   :  { %793 = vperm.xlu1 %1976, %v94_v38   ;;  %v54_v38 = vld [vmem:[%s3055_s3 + $0x44] sm:$0xf] }
  0x63   :  { %784 = vperm.xlu0 %1975, %v93_v39   ;;  %362 = vperm.xlu2 %1977, %v57_v40  }
  0x65   :  { %v2354_v41 = vpop.permute.xlu2 %299 }
  0x66   :  { %v305_v35 = vperm.slane %v2354_v41, %v2391_v63 }
  0x6a   :  { %622 = vperm.xlu1 %1976, %v75_v42  }
  0x6b   :  { %371 = vperm.xlu0 %1975, %v58_v43   ;;  %631 = vperm.xlu2 %1977, %v76_v44   ;;  %v53_v43 = vld [vmem:[%s3055_s3 + $0x40] sm:$0xf] }
  0x6d   :  { %v695_v45 = vpop.permute.xlu2 %694 }
  0x6e   :  { %v700_v23 = vperm.slane %v695_v45, %v2391_v63  ;;  %v482_v45 = vunpack.c.l.bf16 %v296_v34 }
  0x70   :  { %v900_v31 = vunpack.c.l.bf16 %v700_v23 }
  0x72   :  { %209 = vperm.xlu1 %1976, %v40_v46   ;;  %v483_v46 = vunpack.c.l.bf16 %v305_v35 }
  0x73   :  { %766 = vperm.xlu2 %1977, %v91_v47   ;;  %200 = vperm.xlu0 %1975, %v39_v48  }
  0x74   :  { %v453_v51 = vpop.permute.xlu1 %452 }
  0x75   :  { %v309_v52 = vpop.permute.xlu0 %308  ;;  %v2380_v53 = vpop.permute.xlu2 %281  ;;  %v458_v19 = vperm.slane %v453_v51, %v2391_v63 }
  0x76   :  { %v314_v4 = vperm.slane %v309_v52, %v2391_v63 }
  0x77   :  { %v500_v26 = vunpack.c.l.bf16 %v458_v19 }
  0x78   :  { %v484_v10 = vunpack.c.l.bf16 %v314_v4  ;;  %v88_v4 = vld [vmem:[%s3056_s4 + $0x4c] sm:$0xf] }
  0x79   :  { %v532_v39 = vmul.f32 %v500_v26, %v2406_v9 }
  0x7a   :  { %344 = vperm.xlu1 %1976, %v55_v58   ;;  %v516_v16 = vmul.f32 %v484_v10, %v2406_v9  ;;  %v514_v58 = vmul.f32 %v482_v45, %v2406_v9  ;;  %v287_v45 = vperm.slane %v2380_v53, %v2391_v63  ;;  %v148_v53 = vld [vmem:[%s3058_s6 + $0x78] sm:$0xff] }
  0x7b   :  { %353 = vperm.xlu2 %1977, %v56_v59   ;;  %775 = vperm.xlu0 %1975, %v92_v60   ;;  %v564_v48 = vpack.c.bf16 %v532_v39, %v532_v39  ;;  %v515_v59 = vmul.f32 %v483_v46, %v2408_v11 }
  0x7c   :  { %v462_v0 = vpop.permute.xlu1 %461  ;;  %v548_v24 = vpack.c.bf16 %v516_v16, %v516_v16 }
  0x7d   :  { %v318_v1 = vpop.permute.xlu0 %317  ;;  %v2393_v2 = vpop.permute.xlu2 %416  ;;  %v467_v17 = vperm.slane %v462_v0, %v2391_v63  ;;  %v884_v0 = vunpack.c.l.bf16 %v564_v48  ;;  %v547_v10 = vpack.c.bf16 %v515_v59, %v515_v59 }
  0x7e   :  { %v323_v6 = vperm.slane %v318_v1, %v2391_v63  ;;  %v868_v32 = vunpack.c.l.bf16 %v548_v24 }
  0x7f   :  { %v501_v25 = vunpack.c.l.bf16 %v467_v17 }
  0x80   :  { %v485_v12 = vunpack.c.l.bf16 %v323_v6  ;;  %v932_v44 = vadd.f32 %v900_v31, %v868_v32  ;;  %v70_v32 = vld [vmem:[%s3056_s4 + $0x4] sm:$0xf] }
  0x81   :  { %v533_v36 = vmul.f32 %v501_v25, %v2408_v11  ;;  %v867_v25 = vunpack.c.l.bf16 %v547_v10 }
  0x82   :  { %613 = vperm.xlu1 %1976, %v74_v5   ;;  %v517_v20 = vmul.f32 %v485_v12, %v2408_v11 }
  0x83   :  { %604 = vperm.xlu0 %1975, %v73_v7   ;;  %182 = vperm.xlu2 %1977, %v37_v8   ;;  %v565_v47 = vpack.c.bf16 %v533_v36, %v533_v36  ;;  %v546_v8 = vpack.c.bf16 %v514_v58, %v514_v58 }
  0x84   :  { %v2410_v13 = vpop.permute.xlu1 %443  ;;  %v549_v27 = vpack.c.bf16 %v517_v20, %v517_v20 }
  0x85   :  { %v2412_v14 = vpop.permute.xlu0 %434  ;;  %v2414_v15 = vpop.permute.xlu2 %685  ;;  %v885_v60 = vunpack.c.l.bf16 %v565_v47  ;;  %v866_v24 = vunpack.c.l.bf16 %v546_v8  ;;  %v449_v26 = vperm.slane %v2410_v13, %v2391_v63  ;;  %v85_v13 = vld [vmem:[%s3056_s4 + $0x40] sm:$0xf] }
  0x86   :  { %v869_v40 = vunpack.c.l.bf16 %v549_v27  ;;  %v691_v5 = vperm.slane %v2414_v15, %v2391_v63 }
  0x88   :  { %v899_v17 = vunpack.c.l.bf16 %v691_v5 }
  0x8a   :  { %748 = vperm.xlu1 %1976, %v89_v18   ;;  %v931_v34 = vadd.f32 %v899_v17, %v867_v25 }
  0x8b   :  { %191 = vperm.xlu0 %1975, %v38_v21   ;;  %757 = vperm.xlu2 %1977, %v90_v22  }
  0x8c   :  { %v2430_v28 = vpop.permute.xlu1 %272 }
  0x8d   :  { %v704_v29 = vpop.permute.xlu0 %703  ;;  %v2432_v30 = vpop.permute.xlu2 %820  ;;  %v278_v48 = vperm.slane %v2430_v28, %v2391_v63  ;;  %v481_v28 = vunpack.c.l.bf16 %v287_v45 }
  0x8e   :  { %v709_v33 = vperm.slane %v704_v29, %v2391_v63  ;;  %v440_v29 = vperm.slane %v2412_v14, %v2391_v63  ;;  %v499_v14 = vunpack.c.l.bf16 %v449_v26 }
  0x90   :  { %v901_v42 = vunpack.c.l.bf16 %v709_v33  ;;  %v69_v33 = vld [vmem:[%s3056_s4] sm:$0xf]  ;;  %v531_v46 = vmul.f32 %v499_v14, %v2408_v11 }
  0x92   :  { %v933_v41 = vadd.f32 %v901_v42, %v869_v40  ;;  %335 = vperm.xlu1 %1976, %v54_v38   ;;  %v498_v38 = vunpack.c.l.bf16 %v440_v29 }
  0x93   :  { %326 = vperm.xlu0 %1975, %v53_v43   ;;  %586 = vperm.xlu2 %1977, %v71_v37  }
  0x94   :  { %v957_v49 = vpack.c.bf16 %v933_v41, %v932_v44  ;;  %v848_v50 = vpop.permute.xlu1 %847  ;;  %v530_v47 = vmul.f32 %v498_v38, %v2406_v9  ;;  %v161_v38 = vld [vmem:[%s3058_s6 + $0xe0] sm:$0xff] }
  0x95   :  { %v839_v51 = vpop.permute.xlu0 %838  ;;  %v2450_v52 = vpop.permute.xlu2 %407  ;;  %v853_v54 = vperm.slane %v848_v50, %v2391_v63  ;;  %v147_v50 = vld [vmem:[%s3058_s6 + $0x70] sm:$0xff] }
  0x96   :  { %v980_v55 = vunpack.c.l.bf16 %v957_v49  ;;  %v981_v56 = vunpack.c.h.bf16 %v957_v49  ;;  %v844_v57 = vperm.slane %v839_v51, %v2391_v63  ;;  %v86_v51 = vld [vmem:[%s3056_s4 + $0x44] sm:$0xf] }
  0x97   :  { %v917_v61 = vunpack.c.l.bf16 %v853_v54  ;;  %v826_v54 = vperm.slane %v2432_v30, %v2391_v63  ;;  %v513_v30 = vmul.f32 %v481_v28, %v2408_v11 }
  0x98   :  { %1980 = vtanh.f32 %v980_v55  ;;  %v916_v1 = vunpack.c.l.bf16 %v844_v57  ;;  %v563_v55 = vpack.c.bf16 %v531_v46, %v531_v46  ;;  %v480_v57 = vunpack.c.l.bf16 %v278_v48 }
  0x99   :  { %1982 = vtanh.f32 %v981_v56  ;;  %v949_v6 = vadd.f32 %v917_v61, %v885_v60  ;;  %v562_v56 = vpack.c.bf16 %v530_v47, %v530_v47 }
  0x9a   :  { %v948_v7 = vadd.f32 %v916_v1, %v884_v0  ;;  %730 = vperm.xlu1 %1976, %v87_v62   ;;  %v914_v0 = vunpack.c.l.bf16 %v826_v54  ;;  %v512_v8 = vmul.f32 %v480_v57, %v2406_v9 }
  0x9b   :  { %595 = vperm.xlu0 %1975, %v72_v3   ;;  %739 = vperm.xlu2 %1977, %v88_v4   ;;  %v422_v3 = vperm.slane %v2393_v2, %v2391_v63  ;;  %v145_v2 = vld [vmem:[%s3058_s6 + $0x60] sm:$0xff] }
  0x9c   :  { %v965_v12 = vpack.c.bf16 %v949_v6, %v948_v7  ;;  %v677_v16 = vpop.permute.xlu1 %676  ;;  %v883_v6 = vunpack.c.l.bf16 %v563_v55  ;;  %v882_v7 = vunpack.c.l.bf16 %v562_v56 }
  0x9d   :  { %v2467_v18 = vpop.permute.xlu0 %425  ;;  %v682_v19 = vperm.slane %v677_v16, %v2391_v63  ;;  %v2470_v20 = vpop.permute.xlu2 %236  ;;  %v163_v16 = vld [vmem:[%s3058_s6 + $0xf0] sm:$0xff] }
  0x9e   :  { %v1981_v21 = vpop.eup %1980  ;;  %v996_v22 = vunpack.c.l.bf16 %v965_v12  ;;  %v997_v15 = vunpack.c.h.bf16 %v965_v12  ;;  %v431_v4 = vperm.slane %v2467_v18, %v2391_v63  ;;  %v164_v12 = vld [vmem:[%s3058_s6 + $0xf8] sm:$0xff]  ;;  %v946_v17 = vadd.f32 %v914_v0, %v882_v7 }
  0x9f   :  { %v1983_v23 = vpop.eup %1982  ;;  %v898_v27 = vunpack.c.l.bf16 %v682_v19  ;;  %v545_v19 = vpack.c.bf16 %v513_v30, %v513_v30  ;;  %v144_v30 = vld [vmem:[%s3058_s6 + $0x58] sm:$0xff] }
  0xa0   :  { %1984 = vtanh.f32 %v996_v22  ;;  %v1037_v31 = vpack.c.bf16 %v1983_v23, %v1981_v21  ;;  %v496_v21 = vunpack.c.l.bf16 %v422_v3  ;;  %v497_v22 = vunpack.c.l.bf16 %v431_v4  ;;  %v143_v3 = vld [vmem:[%s3058_s6 + $0x50] sm:$0xff] }
  0xa1   :  { %1986 = vtanh.f32 %v997_v15  ;;  %v930_v35 = vadd.f32 %v898_v27, %v866_v24  ;;  %v544_v15 = vpack.c.bf16 %v512_v8, %v512_v8 }
  0xa2   :  { %1366 = vmatpush.bf16.msra.mxu0 %v1037_v31  ;;  %1953 = vmatpush.bf16.msra.mxu2 %v1037_v31 }
  0xa3   :  { %v956_v36 = vpack.c.bf16 %v931_v34, %v930_v35  ;;  %577 = vperm.xlu1 %1976, %v70_v32   ;;  %568 = vperm.xlu0 %1975, %v69_v33   ;;  %v865_v33 = vunpack.c.l.bf16 %v545_v19  ;;  %v528_v34 = vmul.f32 %v496_v21, %v2406_v9  ;;  %v529_v35 = vmul.f32 %v497_v22, %v2408_v11 }
  0xa4   :  { %712 = vperm.xlu2 %1977, %v85_v13   ;;  %v2485_v39 = vpop.permute.xlu1 %263  ;;  %v864_v14 = vunpack.c.l.bf16 %v544_v15 }
  0xa5   :  { %v978_v40 = vunpack.c.l.bf16 %v956_v36  ;;  %v979_v42 = vunpack.c.h.bf16 %v956_v36  ;;  %v2487_v43 = vpop.permute.xlu0 %254  ;;  %v2489_v37 = vpop.permute.xlu2 %811  ;;  %v560_v46 = vpack.c.bf16 %v528_v34, %v528_v34  ;;  %v561_v47 = vpack.c.bf16 %v529_v35, %v529_v35 }
  0xa6   :  { %v1985_v44 = vpop.eup %1984 }
  0xa7   :  { %v1987_v41 = vpop.eup %1986  ;;  %1988 = vtanh.f32 %v978_v40  ;;  %v146_v40 = vld [vmem:[%s3058_s6 + $0x68] sm:$0xff]  ;;  %v880_v56 = vunpack.c.l.bf16 %v560_v46  ;;  %v881_v57 = vunpack.c.l.bf16 %v561_v47 }
  0xa8   :  { %1990 = vtanh.f32 %v979_v42  ;;  %v1045_v49 = vpack.c.bf16 %v1987_v41, %v1985_v44  ;;  %v817_v42 = vperm.slane %v2489_v37, %v2391_v63  ;;  %v162_v41 = vld [vmem:[%s3058_s6 + $0xe8] sm:$0xff] }
  0xa9   :  { %v158_v47 = vld [vmem:[%s3058_s6 + $0xc8] sm:$0xff] }
  0xaa   :  { %1455 = vmatpush.bf16.msra.mxu1 %v1045_v49  ;;  %1961 = vmatpush.bf16.msra.mxu3 %v1045_v49 }
  0xab   :  { %1118 = vperm.xlu1 %1976, %v147_v50   ;;  %721 = vperm.xlu0 %1975, %v86_v51   ;;  %v913_v50 = vunpack.c.l.bf16 %v817_v42 }
  0xac   :  { %1123 = vperm.xlu2 %1977, %v148_v53   ;;  %v2508_v58 = vpop.permute.xlu1 %398 }
  0xad   :  { %v1989_v59 = vpop.eup %1988  ;;  %v830_v60 = vpop.permute.xlu0 %829  ;;  %v945_v4 = vadd.f32 %v913_v50, %v881_v57  ;;  %v404_v22 = vperm.slane %v2508_v58, %v2391_v63 }
  0xae   :  { %v2510_v61 = vpop.permute.xlu2 %640  ;;  %v1991_v62 = vpop.eup %1990  ;;  %v835_v1 = vperm.slane %v830_v60, %v2391_v63 }
  0xaf   :  { %v1036_v5 = vpack.c.bf16 %v1991_v62, %v1989_v59  ;;  %v269_v59 = vperm.slane %v2485_v39, %v2391_v63  ;;  %v260_v62 = vperm.slane %v2487_v43, %v2391_v63  ;;  %v159_v39 = vld [vmem:[%s3058_s6 + $0xd0] sm:$0xff] }
  0xb0   :  { %v915_v10 = vunpack.c.l.bf16 %v835_v1 }
  0xb1   :  { %1367 = vmatpush.bf16.msra.mxu0 %v1036_v5  ;;  %1954 = vmatpush.bf16.msra.mxu2 %v1036_v5  ;;  %v479_v43 = vunpack.c.l.bf16 %v269_v59  ;;  %v478_v7 = vunpack.c.l.bf16 %v260_v62 }
  0xb2   :  { %v947_v18 = vadd.f32 %v915_v10, %v883_v6 }
  0xb3   :  { %1203 = vperm.xlu1 %1976, %v164_v12   ;;  %1198 = vperm.xlu0 %1975, %v163_v16   ;;  %v511_v19 = vmul.f32 %v479_v43, %v2408_v11  ;;  %v510_v21 = vmul.f32 %v478_v7, %v2406_v9  ;;  %v140_v7 = vld [vmem:[%s3058_s6 + $0x38] sm:$0xff] }
  0xb4   :  { %v964_v23 = vpack.c.bf16 %v947_v18, %v946_v17  ;;  %1108 = vperm.xlu2 %1977, %v145_v2   ;;  %v668_v24 = vpop.permute.xlu1 %667  ;;  %v413_v18 = vperm.slane %v2450_v52, %v2391_v63  ;;  %v142_v52 = vld [vmem:[%s3058_s6 + $0x48] sm:$0xff] }
  0xb5   :  { %v673_v25 = vperm.slane %v668_v24, %v2391_v63  ;;  %v659_v26 = vpop.permute.xlu0 %658  ;;  %v160_v24 = vld [vmem:[%s3058_s6 + $0xd8] sm:$0xff] }
  0xb6   :  { %v994_v27 = vunpack.c.l.bf16 %v964_v23  ;;  %v995_v29 = vunpack.c.h.bf16 %v964_v23  ;;  %v664_v31 = vperm.slane %v659_v26, %v2391_v63  ;;  %v2530_v32 = vpop.permute.xlu2 %227  ;;  %v141_v23 = vld [vmem:[%s3058_s6 + $0x40] sm:$0xff]  ;;  %v495_v58 = vunpack.c.l.bf16 %v413_v18 }
  0xb7   :  { %v897_v13 = vunpack.c.l.bf16 %v673_v25  ;;  %v646_v25 = vperm.slane %v2510_v61, %v2391_v63 }
  0xb8   :  { %1992 = vtanh.f32 %v994_v27  ;;  %v896_v36 = vunpack.c.l.bf16 %v664_v31  ;;  %v543_v27 = vpack.c.bf16 %v511_v19, %v511_v19  ;;  %v494_v31 = vunpack.c.l.bf16 %v404_v22 }
  0xb9   :  { %1994 = vtanh.f32 %v995_v29  ;;  %v929_v44 = vadd.f32 %v897_v13, %v865_v33  ;;  %v542_v29 = vpack.c.bf16 %v510_v21, %v510_v21  ;;  %v527_v61 = vmul.f32 %v495_v58, %v2408_v11 }
  0xba   :  { %v928_v45 = vadd.f32 %v896_v36, %v864_v14  ;;  %v894_v14 = vunpack.c.l.bf16 %v646_v25 }
  0xbb   :  { %1188 = vperm.xlu1 %1976, %v161_v38   ;;  %1113 = vperm.xlu0 %1975, %v146_v40   ;;  %v242_v38 = vperm.slane %v2470_v20, %v2391_v63  ;;  %v139_v20 = vld [vmem:[%s3058_s6 + $0x30] sm:$0xff] }
  0xbc   :  { %v955_v48 = vpack.c.bf16 %v929_v44, %v928_v45  ;;  %1193 = vperm.xlu2 %1977, %v162_v41   ;;  %v803_v49 = vpop.permute.xlu1 %802  ;;  %v863_v44 = vunpack.c.l.bf16 %v543_v27  ;;  %v862_v41 = vunpack.c.l.bf16 %v542_v29  ;;  %v526_v45 = vmul.f32 %v494_v31, %v2406_v9 }
  0xbd   :  { %v808_v51 = vperm.slane %v803_v49, %v2391_v63  ;;  %v2546_v53 = vpop.permute.xlu0 %245 }
  0xbe   :  { %v1993_v37 = vpop.eup %1992  ;;  %v976_v54 = vunpack.c.l.bf16 %v955_v48  ;;  %v977_v28 = vunpack.c.h.bf16 %v955_v48  ;;  %v2552_v0 = vpop.permute.xlu2 %362  ;;  %v251_v40 = vperm.slane %v2546_v53, %v2391_v63  ;;  %v157_v48 = vld [vmem:[%s3058_s6 + $0xc0] sm:$0xff]  ;;  %v926_v49 = vadd.f32 %v894_v14, %v862_v41 }
  0xbf   :  { %v1995_v55 = vpop.eup %1994  ;;  %v912_v60 = vunpack.c.l.bf16 %v808_v51  ;;  %v559_v51 = vpack.c.bf16 %v527_v61, %v527_v61  ;;  %v476_v53 = vunpack.c.l.bf16 %v242_v38  ;;  %v137_v61 = vld [vmem:[%s3058_s6 + $0x20] sm:$0xff] }
  0xc0   :  { %1996 = vtanh.f32 %v976_v54  ;;  %v1044_v1 = vpack.c.bf16 %v1995_v55, %v1993_v37  ;;  %v477_v37 = vunpack.c.l.bf16 %v251_v40  ;;  %v558_v54 = vpack.c.bf16 %v526_v45, %v526_v45 }
  0xc1   :  { %1998 = vtanh.f32 %v977_v28  ;;  %v944_v5 = vadd.f32 %v912_v60, %v880_v56 }
  0xc2   :  { %1456 = vmatpush.bf16.msra.mxu1 %v1044_v1  ;;  %1962 = vmatpush.bf16.msra.mxu3 %v1044_v1 }
  0xc3   :  { %v963_v6 = vpack.c.bf16 %v945_v4, %v944_v5  ;;  %1103 = vperm.xlu1 %1976, %v144_v30   ;;  %1098 = vperm.xlu0 %1975, %v143_v3   ;;  %v879_v30 = vunpack.c.l.bf16 %v559_v51  ;;  %v508_v3 = vmul.f32 %v476_v53, %v2406_v9  ;;  %v509_v4 = vmul.f32 %v477_v37, %v2408_v11 }
  0xc4   :  { %1178 = vperm.xlu2 %1977, %v159_v39   ;;  %v2563_v8 = vpop.permute.xlu1 %389  ;;  %v878_v39 = vunpack.c.l.bf16 %v558_v54 }
  0xc5   :  { %v992_v10 = vunpack.c.l.bf16 %v963_v6  ;;  %v993_v12 = vunpack.c.h.bf16 %v963_v6  ;;  %v2565_v16 = vpop.permute.xlu0 %380  ;;  %v155_v6 = vld [vmem:[%s3058_s6 + $0xb0] sm:$0xff]  ;;  %v540_v18 = vpack.c.bf16 %v508_v3, %v508_v3  ;;  %v541_v19 = vpack.c.bf16 %v509_v4, %v509_v4 }
  0xc6   :  { %v1997_v2 = vpop.eup %1996  ;;  %v2584_v26 = vpop.permute.xlu2 %631 }
  0xc7   :  { %v1999_v17 = vpop.eup %1998  ;;  %2000 = vtanh.f32 %v992_v10  ;;  %v637_v10 = vperm.slane %v2584_v26, %v2391_v63  ;;  %v860_v29 = vunpack.c.l.bf16 %v540_v18  ;;  %v861_v31 = vunpack.c.l.bf16 %v541_v19  ;;  %v152_v18 = vld [vmem:[%s3058_s6 + $0x98] sm:$0xff]  ;;  %v151_v19 = vld [vmem:[%s3058_s6 + $0x90] sm:$0xff] }
  0xc8   :  { %2002 = vtanh.f32 %v993_v12  ;;  %v1035_v15 = vpack.c.bf16 %v1999_v17, %v1997_v2  ;;  %v156_v2 = vld [vmem:[%s3058_s6 + $0xb8] sm:$0xff] }
  0xca   :  { %1368 = vmatpush.bf16.msra.mxu0 %v1035_v15  ;;  %1955 = vmatpush.bf16.msra.mxu2 %v1035_v15  ;;  %v893_v15 = vunpack.c.l.bf16 %v637_v10 }
  0xcb   :  { %1088 = vperm.xlu1 %1976, %v141_v23   ;;  %1183 = vperm.xlu0 %1975, %v160_v24  }
  0xcc   :  { %1093 = vperm.xlu2 %1977, %v142_v52   ;;  %v2586_v33 = vpop.permute.xlu1 %218  ;;  %v925_v38 = vadd.f32 %v893_v15, %v861_v31 }
  0xcd   :  { %v2001_v34 = vpop.eup %2000  ;;  %v650_v35 = vpop.permute.xlu0 %649  ;;  %v224_v53 = vperm.slane %v2586_v33, %v2391_v63 }
  0xce   :  { %v2003_v13 = vpop.eup %2002  ;;  %v655_v36 = vperm.slane %v650_v35, %v2391_v63  ;;  %v2604_v55 = vpop.permute.xlu2 %766 }
  0xcf   :  { %v1043_v42 = vpack.c.bf16 %v2003_v13, %v2001_v34  ;;  %v395_v34 = vperm.slane %v2563_v8, %v2391_v63  ;;  %v386_v13 = vperm.slane %v2565_v16, %v2391_v63  ;;  %v153_v8 = vld [vmem:[%s3058_s6 + $0xa0] sm:$0xff] }
  0xd0   :  { %v895_v46 = vunpack.c.l.bf16 %v655_v36  ;;  %v138_v36 = vld [vmem:[%s3058_s6 + $0x28] sm:$0xff] }
  0xd1   :  { %1457 = vmatpush.bf16.msra.mxu1 %v1043_v42  ;;  %1963 = vmatpush.bf16.msra.mxu3 %v1043_v42  ;;  %v493_v16 = vunpack.c.l.bf16 %v395_v34 }
  0xd2   :  { %v927_v50 = vadd.f32 %v895_v46, %v863_v44  ;;  %v492_v44 = vunpack.c.l.bf16 %v386_v13 }
  0xd3   :  { %1173 = vperm.xlu1 %1976, %v158_v47   ;;  %1168 = vperm.xlu0 %1975, %v157_v48  }
  0xd4   :  { %v954_v28 = vpack.c.bf16 %v927_v50, %v926_v49  ;;  %1078 = vperm.xlu2 %1977, %v139_v20   ;;  %v794_v56 = vpop.permute.xlu1 %793  ;;  %v233_v49 = vperm.slane %v2530_v32, %v2391_v63  ;;  %v525_v50 = vmul.f32 %v493_v16, %v2408_v11  ;;  %v524_v51 = vmul.f32 %v492_v44, %v2406_v9  ;;  %v154_v32 = vld [vmem:[%s3058_s6 + $0xa8] sm:$0xff]  ;;  %v149_v16 = vld [vmem:[%s3058_s6 + $0x80] sm:$0xff] }
  0xd5   :  { %v785_v57 = vpop.permute.xlu0 %784  ;;  %v799_v59 = vperm.slane %v794_v56, %v2391_v63  ;;  %v136_v56 = vld [vmem:[%s3058_s6 + $0x18] sm:$0xff] }
  0xd6   :  { %v974_v60 = vunpack.c.l.bf16 %v954_v28  ;;  %v975_v62 = vunpack.c.h.bf16 %v954_v28  ;;  %v790_v1 = vperm.slane %v785_v57, %v2391_v63  ;;  %v2624_v25 = vpop.permute.xlu2 %353  ;;  %v135_v28 = vld [vmem:[%s3058_s6 + $0x10] sm:$0xff]  ;;  %v772_v57 = vperm.slane %v2604_v55, %v2391_v63 }
  0xd7   :  { %v911_v5 = vunpack.c.l.bf16 %v799_v59  ;;  %v475_v33 = vunpack.c.l.bf16 %v233_v49  ;;  %v557_v59 = vpack.c.bf16 %v525_v50, %v525_v50  ;;  %v368_v55 = vperm.slane %v2552_v0, %v2391_v63  ;;  %v133_v0 = vld [vmem:[%s3058_s6] sm:$0xff] }
  0xd8   :  { %2004 = vtanh.f32 %v974_v60  ;;  %v910_v43 = vunpack.c.l.bf16 %v790_v1  ;;  %v556_v60 = vpack.c.bf16 %v524_v51, %v524_v51 }
  0xd9   :  { %2006 = vtanh.f32 %v975_v62  ;;  %v943_v12 = vadd.f32 %v911_v5, %v879_v30  ;;  %v474_v62 = vunpack.c.l.bf16 %v224_v53  ;;  %v908_v5 = vunpack.c.l.bf16 %v772_v57 }
  0xda   :  { %v942_v17 = vadd.f32 %v910_v43, %v878_v39  ;;  %v507_v43 = vmul.f32 %v475_v33, %v2408_v11  ;;  %v877_v10 = vunpack.c.l.bf16 %v557_v59  ;;  %v359_v57 = vperm.slane %v2624_v25, %v2391_v63 }
  0xdb   :  { %1158 = vperm.xlu1 %1976, %v155_v6   ;;  %1083 = vperm.xlu0 %1975, %v140_v7  }
  0xdc   :  { %v962_v21 = vpack.c.bf16 %v943_v12, %v942_v17  ;;  %1163 = vperm.xlu2 %1977, %v156_v2   ;;  %v623_v22 = vpop.permute.xlu1 %622  ;;  %v876_v12 = vunpack.c.l.bf16 %v556_v60  ;;  %v506_v2 = vmul.f32 %v474_v62, %v2406_v9 }
  0xdd   :  { %v2621_v23 = vpop.permute.xlu0 %371  ;;  %v628_v24 = vperm.slane %v623_v22, %v2391_v63 }
  0xde   :  { %v2005_v52 = vpop.eup %2004  ;;  %v990_v26 = vunpack.c.l.bf16 %v962_v21  ;;  %v991_v58 = vunpack.c.h.bf16 %v962_v21  ;;  %v2649_v37 = vpop.permute.xlu2 %182  ;;  %v377_v6 = vperm.slane %v2621_v23, %v2391_v63  ;;  %v940_v21 = vadd.f32 %v908_v5, %v876_v12 }
  0xdf   :  { %v2007_v27 = vpop.eup %2006  ;;  %v892_v35 = vunpack.c.l.bf16 %v628_v24  ;;  %v539_v23 = vpack.c.bf16 %v507_v43, %v507_v43  ;;  %v490_v24 = vunpack.c.l.bf16 %v368_v55 }
  0xe0   :  { %2008 = vtanh.f32 %v990_v26  ;;  %v1034_v14 = vpack.c.bf16 %v2007_v27, %v2005_v52  ;;  %v491_v52 = vunpack.c.l.bf16 %v377_v6  ;;  %v538_v26 = vpack.c.bf16 %v506_v2, %v506_v2 }
  0xe1   :  { %2010 = vtanh.f32 %v991_v58  ;;  %v924_v40 = vadd.f32 %v892_v35, %v860_v29  ;;  %v489_v6 = vunpack.c.l.bf16 %v359_v57 }
  0xe2   :  { %1369 = vmatpush.bf16.msra.mxu0 %v1034_v14  ;;  %1956 = vmatpush.bf16.msra.mxu2 %v1034_v14  ;;  %v859_v14 = vunpack.c.l.bf16 %v539_v23 }
  0xe3   :  { %v953_v42 = vpack.c.bf16 %v925_v38, %v924_v40  ;;  %1073 = vperm.xlu1 %1976, %v138_v36   ;;  %1068 = vperm.xlu0 %1975, %v137_v61   ;;  %v522_v36 = vmul.f32 %v490_v24, %v2406_v9  ;;  %v523_v61 = vmul.f32 %v491_v52, %v2408_v11  ;;  %v858_v40 = vunpack.c.l.bf16 %v538_v26 }
  0xe4   :  { %1148 = vperm.xlu2 %1977, %v153_v8   ;;  %v2639_v41 = vpop.permute.xlu1 %209 }
  0xe5   :  { %v972_v45 = vunpack.c.l.bf16 %v953_v42  ;;  %v973_v46 = vunpack.c.h.bf16 %v953_v42  ;;  %v2641_v47 = vpop.permute.xlu0 %200  ;;  %v134_v42 = vld [vmem:[%s3058_s6 + $0x8] sm:$0xff]  ;;  %v555_v49 = vpack.c.bf16 %v523_v61, %v523_v61  ;;  %v215_v5 = vperm.slane %v2639_v41, %v2391_v63 }
  0xe6   :  { %v2009_v48 = vpop.eup %2008  ;;  %v758_v22 = vpop.permute.xlu2 %757 }
  0xe7   :  { %v2011_v20 = vpop.eup %2010  ;;  %2012 = vtanh.f32 %v972_v45  ;;  %v763_v44 = vperm.slane %v758_v22, %v2391_v63  ;;  %v473_v12 = vunpack.c.l.bf16 %v215_v5 }
  0xe8   :  { %2014 = vtanh.f32 %v973_v46  ;;  %v1042_v54 = vpack.c.bf16 %v2011_v20, %v2009_v48  ;;  %v150_v46 = vld [vmem:[%s3058_s6 + $0x88] sm:$0xff]  ;;  %v554_v20 = vpack.c.bf16 %v522_v36, %v522_v36 }
  0xe9   :  { %v505_v24 = vmul.f32 %v473_v12, %v2408_v11 }
  0xea   :  { %1458 = vmatpush.bf16.msra.mxu1 %v1042_v54  ;;  %1964 = vmatpush.bf16.msra.mxu3 %v1042_v54  ;;  %v907_v54 = vunpack.c.l.bf16 %v763_v44  ;;  %v874_v62 = vunpack.c.l.bf16 %v554_v20 }
  0xeb   :  { %1058 = vperm.xlu1 %1976, %v135_v28   ;;  %1153 = vperm.xlu0 %1975, %v154_v32  }
  0xec   :  { %1063 = vperm.xlu2 %1977, %v136_v56   ;;  %v2662_v1 = vpop.permute.xlu1 %344 }
  0xed   :  { %v2013_v30 = vpop.eup %2012  ;;  %v776_v3 = vpop.permute.xlu0 %775 }
  0xee   :  { %v2015_v4 = vpop.eup %2014  ;;  %v781_v39 = vperm.slane %v776_v3, %v2391_v63  ;;  %v2694_v50 = vpop.permute.xlu2 %586  ;;  %v350_v3 = vperm.slane %v2662_v1, %v2391_v63 }
  0xef   :  { %v1033_v7 = vpack.c.bf16 %v2015_v4, %v2013_v30  ;;  %v875_v30 = vunpack.c.l.bf16 %v555_v49 }
  0xf0   :  { %v909_v17 = vunpack.c.l.bf16 %v781_v39  ;;  %v206_v39 = vperm.slane %v2641_v47, %v2391_v63  ;;  %v188_v47 = vperm.slane %v2649_v37, %v2391_v63  ;;  %v592_v37 = vperm.slane %v2694_v50, %v2391_v63 }
  0xf1   :  { %1370 = vmatpush.bf16.msra.mxu0 %v1033_v7  ;;  %1957 = vmatpush.bf16.msra.mxu2 %v1033_v7  ;;  %v939_v55 = vadd.f32 %v907_v54, %v875_v30  ;;  %v488_v7 = vunpack.c.l.bf16 %v350_v3 }
  0xf2   :  { %v941_v15 = vadd.f32 %v909_v17, %v877_v10  ;;  %v472_v2 = vunpack.c.l.bf16 %v206_v39 }
  0xf3   :  { %1143 = vperm.xlu1 %1976, %v152_v18   ;;  %1138 = vperm.xlu0 %1975, %v151_v19  }
  0xf4   :  { %v961_v58 = vpack.c.bf16 %v941_v15, %v940_v21  ;;  %1048 = vperm.xlu2 %1977, %v133_v0   ;;  %v614_v27 = vpop.permute.xlu1 %613  ;;  %v521_v0 = vmul.f32 %v489_v6, %v2408_v11  ;;  %v520_v15 = vmul.f32 %v488_v7, %v2406_v9  ;;  %v504_v52 = vmul.f32 %v472_v2, %v2406_v9 }
  0xf5   :  { %v619_v29 = vperm.slane %v614_v27, %v2391_v63  ;;  %v605_v31 = vpop.permute.xlu0 %604 }
  0xf6   :  { %v988_v34 = vunpack.c.l.bf16 %v961_v58  ;;  %v989_v35 = vunpack.c.h.bf16 %v961_v58  ;;  %v610_v13 = vperm.slane %v605_v31, %v2391_v63  ;;  %v740_v21 = vpop.permute.xlu2 %739  ;;  %v553_v27 = vpack.c.bf16 %v521_v0, %v521_v0 }
  0xf7   :  { %v891_v38 = vunpack.c.l.bf16 %v619_v29  ;;  %v745_v58 = vperm.slane %v740_v21, %v2391_v63  ;;  %v470_v29 = vunpack.c.l.bf16 %v188_v47  ;;  %v552_v31 = vpack.c.bf16 %v520_v15, %v520_v15 }
  0xf8   :  { %2016 = vtanh.f32 %v988_v34  ;;  %v890_v8 = vunpack.c.l.bf16 %v610_v13  ;;  %v536_v13 = vpack.c.bf16 %v504_v52, %v504_v52 }
  0xf9   :  { %2018 = vtanh.f32 %v989_v35  ;;  %v923_v45 = vadd.f32 %v891_v38, %v859_v14  ;;  %v537_v35 = vpack.c.bf16 %v505_v24, %v505_v24  ;;  %v905_v61 = vunpack.c.l.bf16 %v745_v58 }
  0xfa   :  { %v922_v48 = vadd.f32 %v890_v8, %v858_v40  ;;  %v502_v44 = vmul.f32 %v470_v29, %v2406_v9 }
  0xfb   :  { %1128 = vperm.xlu1 %1976, %v149_v16   ;;  %1053 = vperm.xlu0 %1975, %v134_v42   ;;  %v873_v42 = vunpack.c.l.bf16 %v553_v27 }
  0xfc   :  { %v952_v51 = vpack.c.bf16 %v923_v45, %v922_v48  ;;  %1133 = vperm.xlu2 %1977, %v150_v46   ;;  %v749_v53 = vpop.permute.xlu1 %748  ;;  %v888_v45 = vunpack.c.l.bf16 %v592_v37  ;;  %v872_v48 = vunpack.c.l.bf16 %v552_v31 }
  0xfd   :  { %v754_v28 = vperm.slane %v749_v53, %v2391_v63  ;;  %v192_v32 = vpop.permute.xlu0 %191  ;;  %v856_v53 = vunpack.c.l.bf16 %v536_v13 }
  0xfe   :  { %v2017_v56 = vpop.eup %2016  ;;  %v970_v33 = vunpack.c.l.bf16 %v952_v51  ;;  %v971_v59 = vunpack.c.h.bf16 %v952_v51  ;;  %v197_v23 = vperm.slane %v192_v32, %v2391_v63  ;;  %v857_v51 = vunpack.c.l.bf16 %v537_v35 }
  0xff   :  { %v2019_v60 = vpop.eup %2018  ;;  %v906_v4 = vunpack.c.l.bf16 %v754_v28  ;;  %v937_v32 = vadd.f32 %v905_v61, %v873_v42  ;;  %v1920_v42 = vld [vmem:[%s3057_s5 + $0x4] sm:$0xf0] }
 0x100   :  { %2020 = vtanh.f32 %v970_v33  ;;  %v1041_v43 = vpack.c.bf16 %v2019_v60, %v2017_v56  ;;  %v471_v34 = vunpack.c.l.bf16 %v197_v23  ;;  %v920_v33 = vadd.f32 %v888_v45, %v856_v53  ;;  %v1938_v45 = vld [vmem:[%s3057_s5 + $0x94] sm:$0xf0]  ;;  %v1785_v53 = vld [vmem:[%s3057_s5 + $0x8] sm:$0xf0] }
 0x101   :  { %2022 = vtanh.f32 %v971_v59  ;;  %v938_v25 = vadd.f32 %v906_v4, %v874_v62  ;;  %v534_v60 = vpack.c.bf16 %v502_v44, %v502_v44  ;;  %v1855_v44 = vld [vmem:[%s3057_s5 + $0x90] sm:$0xf] }
 0x102   :  { %1459 = vmatpush.bf16.msra.mxu1 %v1041_v43  ;;  %1965 = vmatpush.bf16.msra.mxu3 %v1041_v43  ;;  %v503_v20 = vmul.f32 %v471_v34, %v2408_v11 }
 0x103   :  { %v960_v10 = vpack.c.bf16 %v939_v55, %v938_v25  ;;  %v854_v2 = vunpack.c.l.bf16 %v534_v60  ;;  %v1922_v60 = vld [vmem:[%s3057_s5 + $0x14] sm:$0xf0] }
 0x104   :  { %v336_v1 = vpop.permute.xlu1 %335  ;;  %v535_v62 = vpack.c.bf16 %v503_v20, %v503_v20 }
 0x105   :  { %v986_v17 = vunpack.c.l.bf16 %v960_v10  ;;  %v987_v18 = vunpack.c.h.bf16 %v960_v10  ;;  %v327_v19 = vpop.permute.xlu0 %326  ;;  %v341_v54 = vperm.slane %v336_v1, %v2391_v63 }
 0x106   :  { %v2021_v41 = vpop.eup %2020  ;;  %v332_v38 = vperm.slane %v327_v19, %v2391_v63  ;;  %v855_v1 = vunpack.c.l.bf16 %v535_v62  ;;  %v1863_v62 = vld [vmem:[%s3057_s5 + $0xa0] sm:$0xf] }
 0x107   :  { %v2023_v22 = vpop.eup %2022  ;;  %2024 = vtanh.f32 %v986_v17  ;;  %v487_v3 = vunpack.c.l.bf16 %v341_v54  ;;  %v1937_v54 = vld [vmem:[%s3057_s5 + $0x94] sm:$0xf] }
 0x108   :  { %2026 = vtanh.f32 %v987_v18  ;;  %v1032_v26 = vpack.c.bf16 %v2023_v22, %v2021_v41  ;;  %v486_v56 = vunpack.c.l.bf16 %v332_v38  ;;  %v713_v41 = vpop.permute.xlu2 %712 }
 0x109   :  { %v519_v17 = vmul.f32 %v487_v3, %v2408_v11  ;;  %v718_v21 = vperm.slane %v713_v41, %v2391_v63  ;;  %v1941_v41 = vld [vmem:[%s3057_s5 + $0xb4] sm:$0xf] }
 0x10a   :  { %1371 = vmatpush.bf16.msra.mxu0 %v1032_v26  ;;  %1958 = vmatpush.bf16.msra.mxu2 %v1032_v26  ;;  %v518_v5 = vmul.f32 %v486_v56, %v2406_v9 }
 0x10b   :  { %v551_v22 = vpack.c.bf16 %v519_v17, %v519_v17  ;;  %v902_v34 = vunpack.c.l.bf16 %v718_v21  ;;  %v1807_v21 = vld [vmem:[%s3057_s5 + $0x30] sm:$0xf] }
 0x10c   :  { %v731_v14 = vpop.permute.xlu1 %730  ;;  %v550_v9 = vpack.c.bf16 %v518_v5, %v518_v5  ;;  %v1921_v5 = vld [vmem:[%s3057_s5 + $0x14] sm:$0xf] }
 0x10d   :  { %v2025_v36 = vpop.eup %2024  ;;  %v736_v40 = vperm.slane %v731_v14, %v2391_v63  ;;  %v596_v8 = vpop.permute.xlu0 %595  ;;  %v871_v35 = vunpack.c.l.bf16 %v551_v22 }
 0x10e   :  { %v2027_v16 = vpop.eup %2026  ;;  %v601_v46 = vperm.slane %v596_v8, %v2391_v63  ;;  %v870_v26 = vunpack.c.l.bf16 %v550_v9  ;;  %v1873_v9 = vld [vmem:[%s3057_s5 + $0xb8] sm:$0xf0] }
 0x10f   :  { %v904_v49 = vunpack.c.l.bf16 %v736_v40  ;;  %v1040_v50 = vpack.c.bf16 %v2027_v16, %v2025_v36 }
 0x110   :  { %v889_v28 = vunpack.c.l.bf16 %v601_v46  ;;  %v934_v36 = vadd.f32 %v902_v34, %v870_v26  ;;  %v2802_v22 = vpop.permute.xlu2 %1123 }
 0x111   :  { %v936_v57 = vadd.f32 %v904_v49, %v872_v48  ;;  %1460 = vmatpush.bf16.msra.mxu1 %v1040_v50  ;;  %1966 = vmatpush.bf16.msra.mxu3 %v1040_v50  ;;  %v1856_v49 = vor.u32 %v1938_v45, %v1855_v44  ;;  %v1919_v50 = vld [vmem:[%s3057_s5 + $0x4] sm:$0xf]  ;;  %v1817_v45 = vld [vmem:[%s3057_s5 + $0x48] sm:$0xf0] }
 0x112   :  { %v921_v59 = vadd.f32 %v889_v28, %v857_v51  ;;  %v1857_v28 = vld [vmem:[%s3057_s5 + $0x98] sm:$0xf0] }
 0x113   :  { %v959_v30 = vpack.c.bf16 %v937_v32, %v936_v57  ;;  %v1788_v57 = vor.u32 %v1919_v50, %v1785_v53  ;;  %v1823_v53 = vld [vmem:[%s3057_s5 + $0x50] sm:$0xf] }
 0x114   :  { %v951_v4 = vpack.c.bf16 %v921_v59, %v920_v33  ;;  %v1860_v33 = vor.u32 %v1937_v54, %v1857_v28  ;;  %v1791_v59 = vld [vmem:[%s3057_s5 + $0x10] sm:$0xf]  ;;  %v1930_v54 = vld [vmem:[%s3057_s5 + $0x54] sm:$0xf0]  ;;  %v1895_v28 = vld [vmem:[%s3057_s5 + $0xe0] sm:$0xf] }
 0x115   :  { %v984_v39 = vunpack.c.l.bf16 %v959_v30  ;;  %v985_v43 = vunpack.c.h.bf16 %v959_v30  ;;  %v578_v55 = vpop.permute.xlu1 %577  ;;  %v569_v25 = vpop.permute.xlu0 %568  ;;  %v1940_v30 = vld [vmem:[%s3057_s5 + $0xa4] sm:$0xf0]  ;;  %v1792_v3 = vor.u32 %v1922_v60, %v1791_v59  ;;  %v1929_v60 = vld [vmem:[%s3057_s5 + $0x54] sm:$0xf] }
 0x116   :  { %v968_v6 = vunpack.c.l.bf16 %v951_v4  ;;  %v969_v7 = vunpack.c.h.bf16 %v951_v4  ;;  %v583_v10 = vperm.slane %v578_v55, %v2391_v63  ;;  %v574_v12 = vperm.slane %v569_v25, %v2391_v63  ;;  %v1865_v55 = vld [vmem:[%s3057_s5 + $0xa8] sm:$0xf0] }
 0x117   :  { %2028 = vtanh.f32 %v984_v39  ;;  %v1864_v4 = vor.u32 %v1940_v30, %v1863_v62  ;;  %v1793_v39 = vld [vmem:[%s3057_s5 + $0x18] sm:$0xf0] }
 0x118   :  { %2030 = vtanh.f32 %v985_v43  ;;  %v887_v18 = vunpack.c.l.bf16 %v583_v10  ;;  %v886_v19 = vunpack.c.l.bf16 %v574_v12  ;;  %v1939_v43 = vld [vmem:[%s3057_s5 + $0xa4] sm:$0xf]  ;;  %v1796_v25 = vor.u32 %v1921_v5, %v1793_v39  ;;  %v1924_v10 = vld [vmem:[%s3057_s5 + $0x24] sm:$0xf0]  ;;  %v1871_v12 = vld [vmem:[%s3057_s5 + $0xb0] sm:$0xf] }
 0x119   :  { %2032 = vtanh.f32 %v968_v6  ;;  %v1868_v6 = vor.u32 %v1939_v43, %v1865_v55  ;;  %v1825_v30 = vld [vmem:[%s3057_s5 + $0x58] sm:$0xf0] }
 0x11a   :  { %2034 = vtanh.f32 %v969_v7  ;;  %v919_v0 = vadd.f32 %v887_v18, %v855_v1  ;;  %v918_v47 = vadd.f32 %v886_v19, %v854_v2  ;;  %v1799_v7 = vld [vmem:[%s3057_s5 + $0x20] sm:$0xf]  ;;  %v1942_v2 = vld [vmem:[%s3057_s5 + $0xb4] sm:$0xf0]  ;;  %v1923_v18 = vld [vmem:[%s3057_s5 + $0x24] sm:$0xf]  ;;  %v1828_v5 = vor.u32 %v1929_v60, %v1825_v30 }
 0x11b   :  { %v1800_v1 = vor.u32 %v1924_v10, %v1799_v7  ;;  %v1872_v17 = vor.u32 %v1942_v2, %v1871_v12  ;;  %v1801_v19 = vld [vmem:[%s3057_s5 + $0x28] sm:$0xf0]  ;;  %v1903_v7 = vld [vmem:[%s3057_s5 + $0xf0] sm:$0xf]  ;;  %v1950_v10 = vld [vmem:[%s3057_s5 + $0xf4] sm:$0xf0] }
 0x11c   :  { %v950_v15 = vpack.c.bf16 %v919_v0, %v918_v47  ;;  %v1804_v0 = vor.u32 %v1923_v18, %v1801_v19  ;;  %v1876_v47 = vor.u32 %v1941_v41, %v1873_v9  ;;  %v1931_v18 = vld [vmem:[%s3057_s5 + $0x64] sm:$0xf]  ;;  %v1833_v19 = vld [vmem:[%s3057_s5 + $0x68] sm:$0xf0]  ;;  %v1949_v41 = vld [vmem:[%s3057_s5 + $0xf4] sm:$0xf] }
 0x11d   :  { %v2029_v23 = vpop.eup %2028  ;;  %v722_v24 = vpop.permute.xlu0 %721  ;;  %v1905_v9 = vld [vmem:[%s3057_s5 + $0xf8] sm:$0xf0] }
 0x11e   :  { %v2031_v52 = vpop.eup %2030  ;;  %v966_v58 = vunpack.c.l.bf16 %v950_v15  ;;  %v967_v27 = vunpack.c.h.bf16 %v950_v15  ;;  %v727_v11 = vperm.slane %v722_v24, %v2391_v63  ;;  %v1783_v63 = vld [vmem:[%s3057_s5] sm:$0xf]  ;;  %v1926_v15 = vld [vmem:[%s3057_s5 + $0x34] sm:$0xf0]  ;;  %v1944_v24 = vld [vmem:[%s3057_s5 + $0xc4] sm:$0xf0] }
 0x11f   :  { %v2033_v29 = vpop.eup %2032  ;;  %v1039_v37 = vpack.c.bf16 %v2031_v52, %v2029_v23  ;;  %v1784_v20 = vor.u32 %v1920_v42, %v1783_v63  ;;  %v1879_v23 = vld [vmem:[%s3057_s5 + $0xc0] sm:$0xf]  ;;  %v1808_v52 = vor.u32 %v1926_v15, %v1807_v21  ;;  %v1927_v42 = vld [vmem:[%s3057_s5 + $0x44] sm:$0xf]  ;;  %v1908_v21 = vor.u32 %v1949_v41, %v1905_v9 }
 0x120   :  { %v2035_v31 = vpop.eup %2034  ;;  %2036 = vtanh.f32 %v966_v58  ;;  %v903_v13 = vunpack.c.l.bf16 %v727_v11  ;;  %v1880_v26 = vor.u32 %v1944_v24, %v1879_v23  ;;  %v1809_v11 = vld [vmem:[%s3057_s5 + $0x38] sm:$0xf0]  ;;  %v1839_v24 = vld [vmem:[%s3057_s5 + $0x70] sm:$0xf] }
 0x121   :  { %2038 = vtanh.f32 %v967_v27  ;;  %v1031_v14 = vpack.c.bf16 %v2035_v31, %v2033_v29  ;;  %1461 = vmatpush.bf16.msra.mxu1 %v1039_v37  ;;  %1967 = vmatpush.bf16.msra.mxu3 %v1039_v37  ;;  %v1925_v27 = vld [vmem:[%s3057_s5 + $0x34] sm:$0xf]  ;;  %v1943_v29 = vld [vmem:[%s3057_s5 + $0xc4] sm:$0xf]  ;;  %v1881_v37 = vld [vmem:[%s3057_s5 + $0xc8] sm:$0xf0]  ;;  %v2827_v31 = vpop.permute.xlu2 %1108 }
 0x122   :  { %v935_v61 = vadd.f32 %v903_v13, %v871_v35  ;;  %v1812_v34 = vor.u32 %v1925_v27, %v1809_v11  ;;  %v1884_v35 = vor.u32 %v1943_v29, %v1881_v37  ;;  %v2829_v13 = vpop.permute.xlu1 %1118  ;;  %v1933_v29 = vld [vmem:[%s3057_s5 + $0x74] sm:$0xf]  ;;  %v1841_v37 = vld [vmem:[%s3057_s5 + $0x78] sm:$0xf0] }
 0x123   :  { %1372 = vmatpush.bf16.msra.mxu0 %v1031_v14  ;;  %1959 = vmatpush.bf16.msra.mxu2 %v1031_v14  ;;  %v1815_v14 = vld [vmem:[%s3057_s5 + $0x40] sm:$0xf] }
 0x124   :  { %v958_v38 = vpack.c.bf16 %v935_v61, %v934_v36  ;;  %v1928_v36 = vld [vmem:[%s3057_s5 + $0x44] sm:$0xf0]  ;;  %v1887_v61 = vld [vmem:[%s3057_s5 + $0xd0] sm:$0xf] }
 0x125   :  { %v2813_v58 = vpop.permute.xlu0 %1198 }
 0x126   :  { %v2037_v40 = vpop.eup %2036  ;;  %v982_v8 = vunpack.c.l.bf16 %v958_v38  ;;  %v983_v16 = vunpack.c.h.bf16 %v958_v38  ;;  %v1946_v38 = vld [vmem:[%s3057_s5 + $0xd4] sm:$0xf0] }
 0x127   :  { %v2039_v46 = vpop.eup %2038 }
 0x128   :  { %2040 = vtanh.f32 %v982_v8  ;;  %v1030_v48 = vpack.c.bf16 %v2039_v46, %v2037_v40  ;;  %v1816_v40 = vor.u32 %v1928_v36, %v1815_v14  ;;  %v1888_v8 = vor.u32 %v1946_v38, %v1887_v61  ;;  %v1945_v46 = vld [vmem:[%s3057_s5 + $0xd4] sm:$0xf]  ;;  %v1847_v61 = vld [vmem:[%s3057_s5 + $0x80] sm:$0xf]  ;;  %v1936_v38 = vld [vmem:[%s3057_s5 + $0x84] sm:$0xf0] }
 0x129   :  { %2042 = vtanh.f32 %v983_v16  ;;  %v2845_v16 = vpop.permute.xlu2 %1193 }
 0x12a   :  { %1373 = vmatpush.bf16.msra.mxu0 %v1030_v48  ;;  %1960 = vmatpush.bf16.msra.mxu2 %v1030_v48  ;;  %v2850_v44 = vpop.permute.xlu1 %1203  ;;  %v1889_v48 = vld [vmem:[%s3057_s5 + $0xd8] sm:$0xf0] }
 0x12b   :  { %v1892_v50 = vor.u32 %v1945_v46, %v1889_v48  ;;  %v1935_v46 = vld [vmem:[%s3057_s5 + $0x84] sm:$0xf]  ;;  %v1849_v48 = vld [vmem:[%s3057_s5 + $0x88] sm:$0xf0] }
 0x12d   :  { %1374 = vmatmul.bf16.vlgmr.msra.gmra.mxu0 %v1784_v20  ;;  %1419 = vmatmul.bf16.vlgmr.msra.gmra.mxu2 %v1856_v49  ;;  %v2843_v63 = vpop.permute.xlu0 %1113  ;;  %v1820_v49 = vor.u32 %v1927_v42, %v1817_v45 }
 0x12e   :  { %v2041_v51 = vpop.eup %2040 }
 0x12f   :  { %v2043_v32 = vpop.eup %2042 }
 0x130   :  { %v1038_v56 = vpack.c.bf16 %v2043_v32, %v2041_v51  ;;  %v1948_v32 = vld [vmem:[%s3057_s5 + $0xe4] sm:$0xf0] }
 0x131   :  { %v2863_v51 = vpop.permute.xlu2 %1178 }
 0x132   :  { %1462 = vmatpush.bf16.msra.mxu1 %v1038_v56  ;;  %1968 = vmatpush.bf16.msra.mxu3 %v1038_v56  ;;  %v2877_v56 = vpop.permute.xlu1 %1188 }
 0x135   :  { %1463 = vmatmul.bf16.vlgmr.msra.gmra.mxu1 %v1788_v57  ;;  %1508 = vmatmul.bf16.vlgmr.msra.gmra.mxu3 %v1860_v33  ;;  %v2861_v20 = vpop.permute.xlu0 %1098  ;;  %v1824_v57 = vor.u32 %v1930_v54, %v1823_v53  ;;  %v1896_v33 = vor.u32 %v1948_v32, %v1895_v28  ;;  %v1852_v54 = vor.u32 %v1935_v46, %v1849_v48 }
 0x139   :  { %v2884_v62 = vpop.permute.xlu2 %1093 }
 0x13a   :  { %v2895_v43 = vpop.permute.xlu1 %1103 }
 0x13d   :  { %1379 = vmatmul.bf16.gmra.mxu0 %v1792_v3  ;;  %1424 = vmatmul.bf16.gmra.mxu2 %v1864_v4  ;;  %v2879_v59 = vpop.permute.xlu0 %1183  ;;  %v1947_v3 = vld [vmem:[%s3057_s5 + $0xe4] sm:$0xf]  ;;  %v1897_v4 = vld [vmem:[%s3057_s5 + $0xe8] sm:$0xf0] }
 0x13e   :  { %v1900_v39 = vor.u32 %v1947_v3, %v1897_v4 }
 0x141   :  { %v2911_v12 = vpop.permute.xlu2 %1078 }
 0x145   :  { %1468 = vmatmul.bf16.gmra.mxu1 %v1796_v25  ;;  %1513 = vmatmul.bf16.gmra.mxu3 %v1868_v6  ;;  %v2897_v55 = vpop.permute.xlu0 %1168  ;;  %v1831_v25 = vld [vmem:[%s3057_s5 + $0x60] sm:$0xf]  ;;  %v1932_v6 = vld [vmem:[%s3057_s5 + $0x64] sm:$0xf0] }
 0x146   :  { %v1832_v2 = vor.u32 %v1932_v6, %v1831_v25 }
 0x149   :  { %v2929_v15 = vpop.permute.xlu2 %1163 }
 0x14d   :  { %1384 = vmatmul.bf16.gmra.mxu0 %v1800_v1  ;;  %1429 = vmatmul.bf16.gmra.mxu2 %v1872_v17  ;;  %v1904_v1 = vor.u32 %v1950_v10, %v1903_v7  ;;  %v2913_v17 = vpop.permute.xlu1 %1088 }
 0x151   :  { %v1149_v11 = vpop.permute.xlu2 %1148 }
 0x155   :  { %1473 = vmatmul.bf16.gmra.mxu1 %v1804_v0  ;;  %1518 = vmatmul.bf16.gmra.mxu3 %v1876_v47  ;;  %v2927_v0 = vpop.permute.xlu0 %1083  ;;  %v1836_v47 = vor.u32 %v1931_v18, %v1833_v19  ;;  %v2931_v23 = vpop.permute.xlu1 %1173 }
 0x159   :  { %v1064_v36 = vpop.permute.xlu2 %1063 }
 0x15d   :  { %1389 = vmatmul.bf16.gmra.mxu0 %v1808_v52  ;;  %1434 = vmatmul.bf16.gmra.mxu2 %v1880_v26  ;;  %v1934_v52 = vld [vmem:[%s3057_s5 + $0x74] sm:$0xf0]  ;;  %v1069_v26 = vpop.permute.xlu0 %1068 }
 0x15e   :  { %v1840_v27 = vor.u32 %v1934_v52, %v1839_v24 }
 0x165   :  { %1478 = vmatmul.bf16.gmra.mxu1 %v1812_v34  ;;  %1523 = vmatmul.bf16.gmra.mxu3 %v1884_v35  ;;  %v1159_v34 = vpop.permute.xlu1 %1158  ;;  %v1844_v35 = vor.u32 %v1933_v29, %v1841_v37  ;;  %v1154_v14 = vpop.permute.xlu0 %1153 }
 0x16d   :  { %1394 = vmatmul.bf16.gmra.mxu0 %v1816_v40  ;;  %1439 = vmatmul.bf16.gmra.mxu2 %v1888_v8  ;;  %v1848_v40 = vor.u32 %v1936_v38, %v1847_v61  ;;  %v1074_v8 = vpop.permute.xlu1 %1073  ;;  %v1139_v45 = vpop.permute.xlu0 %1138 }
 0x175   :  { %1483 = vmatmul.bf16.gmra.mxu1 %v1820_v49  ;;  %1528 = vmatmul.bf16.gmra.mxu3 %v1892_v50  ;;  %v1049_v49 = vpop.permute.xlu2 %1048  ;;  %v1054_v60 = vpop.permute.xlu0 %1053 }
 0x17d   :  { %1399 = vmatmul.bf16.gmra.mxu0 %v1824_v57  ;;  %1444 = vmatmul.bf16.gmra.mxu2 %v1896_v33  ;;  %v1059_v33 = vpop.permute.xlu1 %1058 }
 0x185   :  { %1488 = vmatmul.bf16.gmra.mxu1 %v1828_v5  ;;  %1533 = vmatmul.bf16.gmra.mxu3 %v1900_v39 }
 0x18d   :  { %1404 = vmatmul.bf16.gmra.mxu0 %v1832_v2  ;;  %1449 = vmatmul.bf16.gmra.mxu2 %v1904_v1  ;;  %v1144_v2 = vpop.permute.xlu1 %1143 }
 0x195   :  { %1493 = vmatmul.bf16.gmra.mxu1 %v1836_v47  ;;  %1538 = vmatmul.bf16.gmra.mxu3 %v1908_v21 }
 0x19d   :  { %1409 = vmatmul.bf16.gmra.mxu0 %v1840_v27 }
 0x1a5   :  { %1498 = vmatmul.bf16.gmra.mxu1 %v1844_v35 }
 0x1aa   :  { %v1375_v42 = vpop.f32.mrf.mxu0 }
 0x1ab   :  { %v1376_v53 = vadd.f32 %v1375_v42, %v1049_v49 }
 0x1ad   :  { %1414 = vmatmul.bf16.gmra.mxu0 %v1848_v40 }
 0x1b0   :  { %v1420_v50 = vpop.f32.mrf.mxu2 }
 0x1b1   :  { %v1421_v30 = vadd.f32 %v1420_v50, %v1139_v45 }
 0x1b2   :  { %v1377_v28 = vpop.f32.mrf.mxu0  ;;  %v1464_v32 = vpop.f32.mrf.mxu1 }
 0x1b3   :  { %v1465_v57 = vadd.f32 %v1464_v32, %v1376_v53  ;;  %v1378_v5 = vadd.f32 %v1377_v28, %v1054_v60 }
 0x1b5   :  { %1503 = vmatmul.bf16.gmra.mxu1 %v1852_v54 }
 0x1b8   :  { %v1422_v3 = vpop.f32.mrf.mxu2  ;;  %v1509_v4 = vpop.f32.mrf.mxu3 }
 0x1b9   :  { %v1510_v39 = vadd.f32 %v1509_v4, %v1421_v30  ;;  %v1423_v1 = vadd.f32 %v1422_v3, %v1144_v2 }
 0x1ba   :  { %v1380_v25 = vpop.f32.mrf.mxu0  ;;  %v1466_v6 = vpop.f32.mrf.mxu1 }
 0x1bb   :  { %v1467_v7 = vadd.f32 %v1466_v6, %v1378_v5  ;;  %v1381_v41 = vadd.f32 %v1380_v25, %v1059_v33 }
 0x1bd   :  { %v2957_v10 = vpack.c.bf16 %v1467_v7, %v1465_v57 }
 0x1c0   :  { %v1425_v18 = vpop.f32.mrf.mxu2  ;;  %v1511_v19 = vpop.f32.mrf.mxu3 }
 0x1c1   :  { %v1512_v9 = vadd.f32 %v1511_v19, %v1423_v1  ;;  %v1426_v27 = vadd.f32 %v1425_v18, %v1149_v11 }
 0x1c2   :  { %v1382_v47 = vpop.f32.mrf.mxu0  ;;  %v1469_v21 = vpop.f32.mrf.mxu1 }
 0x1c3   :  { %v2959_v24 = vpack.c.bf16 %v1512_v9, %v1510_v39  ;;  %v1470_v52 = vadd.f32 %v1469_v21, %v1381_v41  ;;  %v1383_v35 = vadd.f32 %v1382_v47, %v1064_v36 }
 0x1c8   :  { %v1427_v29 = vpop.f32.mrf.mxu2  ;;  %v1514_v37 = vpop.f32.mrf.mxu3 }
 0x1c9   :  { %v1515_v61 = vadd.f32 %v1514_v37, %v1426_v27  ;;  %v1428_v46 = vadd.f32 %v1427_v29, %v1154_v14 }
 0x1ca   :  { %v1385_v38 = vpop.f32.mrf.mxu0  ;;  %v1471_v40 = vpop.f32.mrf.mxu1 }
 0x1cb   :  { %v1472_v42 = vadd.f32 %v1471_v40, %v1383_v35  ;;  %v1386_v50 = vadd.f32 %v1385_v38, %v1069_v26 }
 0x1cd   :  { %v2961_v45 = vpack.c.bf16 %v1472_v42, %v1470_v52 }
 0x1d0   :  { %v1430_v48 = vpop.f32.mrf.mxu2  ;;  %v1516_v49 = vpop.f32.mrf.mxu3 }
 0x1d1   :  { %v1517_v53 = vadd.f32 %v1516_v49, %v1428_v46  ;;  %v1431_v11 = vadd.f32 %v1430_v48, %v1159_v34 }
 0x1d2   :  { %v1387_v54 = vpop.f32.mrf.mxu0  ;;  %v1474_v28 = vpop.f32.mrf.mxu1 }
 0x1d3   :  { %v2963_v32 = vpack.c.bf16 %v1517_v53, %v1515_v61  ;;  %v1475_v57 = vadd.f32 %v1474_v28, %v1386_v50  ;;  %v1388_v36 = vadd.f32 %v1387_v54, %v1074_v8 }
 0x1d8   :  { %v1432_v33 = vpop.f32.mrf.mxu2  ;;  %v1519_v60 = vpop.f32.mrf.mxu3 }
 0x1d9   :  { %v1520_v30 = vadd.f32 %v1519_v60, %v1431_v11  ;;  %v1433_v14 = vadd.f32 %v1432_v33, %v2929_v15 }
 0x1da   :  { %v1390_v3 = vpop.f32.mrf.mxu0  ;;  %v1476_v4 = vpop.f32.mrf.mxu1 }
 0x1db   :  { %v1477_v5 = vadd.f32 %v1476_v4, %v1388_v36  ;;  %v1391_v6 = vadd.f32 %v1390_v3, %v2911_v12 }
 0x1dd   :  { %v2965_v39 = vpack.c.bf16 %v1477_v5, %v1475_v57 }
 0x1e0   :  { %v1435_v25 = vpop.f32.mrf.mxu2  ;;  %v1521_v26 = vpop.f32.mrf.mxu3 }
 0x1e1   :  { %v1522_v7 = vadd.f32 %v1521_v26, %v1433_v14  ;;  %v1436_v8 = vadd.f32 %v1435_v25, %v2897_v55 }
 0x1e2   :  { %v1392_v2 = vpop.f32.mrf.mxu0  ;;  %v1479_v1 = vpop.f32.mrf.mxu1 }
 0x1e3   :  { %v2969_v18 = vpack.c.bf16 %v1522_v7, %v1520_v30  ;;  %v1480_v34 = vadd.f32 %v1479_v1, %v1391_v6  ;;  %v1393_v9 = vadd.f32 %v1392_v2, %v2927_v0 }
 0x1e8   :  { %v1437_v19 = vpop.f32.mrf.mxu2  ;;  %v1524_v41 = vpop.f32.mrf.mxu3 }
 0x1e9   :  { %v1525_v47 = vadd.f32 %v1524_v41, %v1436_v8  ;;  %v1438_v26 = vadd.f32 %v1437_v19, %v2931_v23 }
 0x1ea   :  { %v1395_v21 = vpop.f32.mrf.mxu0  ;;  %v1481_v52 = vpop.f32.mrf.mxu1 }
 0x1eb   :  { %v1482_v15 = vadd.f32 %v1481_v52, %v1393_v9  ;;  %v1396_v37 = vadd.f32 %v1395_v21, %v2913_v17 }
 0x1ed   :  { %v2973_v27 = vpack.c.bf16 %v1482_v15, %v1480_v34 }
 0x1f0   :  { %v1440_v29 = vpop.f32.mrf.mxu2  ;;  %v1526_v12 = vpop.f32.mrf.mxu3 }
 0x1f1   :  { %v1441_v34 = vadd.f32 %v1440_v29, %v2863_v51  ;;  %v1527_v8 = vadd.f32 %v1526_v12, %v1438_v26 }
 0x1f2   :  { %v2976_v35 = vpop.f32.mrf.mxu0  ;;  %v1484_v61 = vpop.f32.mrf.mxu1 }
 0x1f3   :  { %v2978_v38 = vadd.f32 %v1484_v61, %v1396_v37  ;;  %v1556_v23 = vpack.c.bf16 %v1527_v8, %v1525_v47 }
 0x1f5   :  { %v1584_v12 = vunpack.c.l.bf16 %v1556_v23 }
 0x1f8   :  { %v1442_v55 = vpop.f32.mrf.mxu2  ;;  %v1529_v40 = vpop.f32.mrf.mxu3 }
 0x1f9   :  { %v1443_v6 = vadd.f32 %v1442_v55, %v2879_v59  ;;  %v1530_v15 = vadd.f32 %v1529_v40, %v1441_v34 }
 0x1fa   :  { %v1400_v42 = vpop.f32.mrf.mxu0  ;;  %v2980_v46 = vpop.f32.mrf.mxu1 }
 0x200   :  { %v1445_v0 = vpop.f32.mrf.mxu2  ;;  %v1531_v48 = vpop.f32.mrf.mxu3 }
 0x201   :  { %v1446_v14 = vadd.f32 %v1445_v0, %v2877_v56  ;;  %v1532_v41 = vadd.f32 %v1531_v48, %v1443_v6 }
 0x202   :  { %v1402_v49 = vpop.f32.mrf.mxu0  ;;  %v1489_v50 = vpop.f32.mrf.mxu1 }
 0x203   :  { %v1557_v19 = vpack.c.bf16 %v1532_v41, %v1530_v15 }
 0x205   :  { %v1586_v48 = vunpack.c.l.bf16 %v1557_v19 }
 0x208   :  { %v1447_v53 = vpop.f32.mrf.mxu2  ;;  %v1534_v54 = vpop.f32.mrf.mxu3 }
 0x209   :  { %v1448_v4 = vadd.f32 %v1447_v53, %v2845_v16  ;;  %v1535_v7 = vadd.f32 %v1534_v54, %v1446_v14  ;;  %v1403_v53 = vadd.f32 %v1402_v49, %v2895_v43  ;;  %v1398_v43 = vadd.f32 %v2976_v35, %v2884_v62 }
 0x20a   :  { %v1405_v28 = vpop.f32.mrf.mxu0  ;;  %v1491_v57 = vpop.f32.mrf.mxu1  ;;  %v1582_v62 = vunpack.c.l.bf16 %v2969_v18 }
 0x20b   :  { %v1406_v51 = vadd.f32 %v1405_v28, %v2827_v31 }
 0x210   :  { %v1536_v11 = vpop.f32.mrf.mxu3  ;;  %v1450_v17 = vpop.f32.mrf.mxu2 }
 0x211   :  { %v1537_v25 = vadd.f32 %v1536_v11, %v1448_v4  ;;  %v1451_v2 = vadd.f32 %v1450_v17, %v2813_v58  ;;  %v1587_v11 = vunpack.c.h.bf16 %v1557_v19  ;;  %v1492_v17 = vadd.f32 %v1491_v57, %v1403_v53 }
 0x212   :  { %v1407_v33 = vpop.f32.mrf.mxu0  ;;  %v1494_v60 = vpop.f32.mrf.mxu1 }
 0x213   :  { %v1558_v21 = vpack.c.bf16 %v1537_v25, %v1535_v7  ;;  %v1408_v55 = vadd.f32 %v1407_v33, %v2843_v63  ;;  %v1495_v40 = vadd.f32 %v1494_v60, %v1406_v51  ;;  %v1401_v63 = vadd.f32 %v1400_v42, %v2861_v20 }
 0x214   :  { %v1487_v20 = vadd.f32 %v2980_v46, %v1398_v43  ;;  %v1566_v51 = vunpack.c.l.bf16 %v2973_v27 }
 0x215   :  { %v1588_v59 = vunpack.c.l.bf16 %v1558_v21  ;;  %v1490_v49 = vadd.f32 %v1489_v50, %v1401_v63  ;;  %v1583_v50 = vunpack.c.h.bf16 %v2969_v18 }
 0x217   :  { %v1549_v42 = vpack.c.bf16 %v1492_v17, %v1490_v49  ;;  %v1565_v49 = vunpack.c.h.bf16 %v2965_v39 }
 0x218   :  { %v1539_v36 = vpop.f32.mrf.mxu3  ;;  %v1452_v5 = vpop.f32.mrf.mxu2 }
 0x219   :  { %v1453_v1 = vadd.f32 %v1452_v5, %v2850_v44  ;;  %v1540_v16 = vadd.f32 %v1539_v36, %v1451_v2  ;;  %v1589_v44 = vunpack.c.h.bf16 %v1558_v21  ;;  %v1548_v2 = vpack.c.bf16 %v1487_v20, %v2978_v38 }
 0x21a   :  { %v1410_v30 = vpop.f32.mrf.mxu0  ;;  %v1496_v3 = vpop.f32.mrf.mxu1  ;;  %v1571_v41 = vunpack.c.h.bf16 %v1549_v42 }
 0x21b   :  { %v1497_v29 = vadd.f32 %v1496_v3, %v1408_v55  ;;  %v1411_v47 = vadd.f32 %v1410_v30, %v2829_v13  ;;  %v1585_v3 = vunpack.c.h.bf16 %v1556_v23  ;;  %v1568_v15 = vunpack.c.l.bf16 %v1548_v2 }
 0x21c   :  { %v1578_v23 = vunpack.c.l.bf16 %v2959_v24  ;;  %v1569_v19 = vunpack.c.h.bf16 %v1548_v2 }
 0x21d   :  { %v1550_v31 = vpack.c.bf16 %v1497_v29, %v1495_v40 }
 0x21f   :  { %v1572_v30 = vunpack.c.l.bf16 %v1550_v31  ;;  %v1573_v6 = vunpack.c.h.bf16 %v1550_v31 }
 0x220   :  { %v1541_v9 = vpop.f32.mrf.mxu3 }
 0x221   :  { %v1542_v52 = vadd.f32 %v1541_v9, %v1453_v1  ;;  %v1570_v1 = vunpack.c.l.bf16 %v1549_v42  ;;  %v1580_v9 = vunpack.c.l.bf16 %v2963_v32 }
 0x222   :  { %v1412_v56 = vpop.f32.mrf.mxu0  ;;  %v1499_v37 = vpop.f32.mrf.mxu1 }
 0x223   :  { %v1559_v61 = vpack.c.bf16 %v1542_v52, %v1540_v16  ;;  %v1413_v54 = vadd.f32 %v1412_v56, %v2802_v22  ;;  %v1500_v28 = vadd.f32 %v1499_v37, %v1411_v47  ;;  %v1581_v16 = vunpack.c.h.bf16 %v2963_v32  ;;  %v1134_v37 = vpop.permute.xlu2 %1133 }
 0x225   :  { %v1590_v58 = vunpack.c.l.bf16 %v1559_v61  ;;  %v1591_v0 = vunpack.c.h.bf16 %v1559_v61  ;;  %v1129_v61 = vpop.permute.xlu1 %1128 }
 0x227   :  { %2044 = vtanh.f32 %v1590_v58 }
 0x228   :  { %2046 = vtanh.f32 %v1591_v0 }
 0x229   :  { %2048 = vtanh.f32 %v1588_v59 }
 0x22a   :  { %2050 = vtanh.f32 %v1589_v44  ;;  %v1501_v33 = vpop.f32.mrf.mxu1  ;;  %v1415_v60 = vpop.f32.mrf.mxu0  ;;  %v1579_v44 = vunpack.c.h.bf16 %v2959_v24 }
 0x22b   :  { %v1502_v36 = vadd.f32 %v1501_v33, %v1413_v54  ;;  %2052 = vtanh.f32 %v1584_v12  ;;  %v1416_v55 = vadd.f32 %v1415_v60, %v1129_v61  ;;  %v1567_v54 = vunpack.c.h.bf16 %v2973_v27 }
 0x22c   :  { %2054 = vtanh.f32 %v1586_v48  ;;  %v1564_v33 = vunpack.c.l.bf16 %v2965_v39 }
 0x22d   :  { %v2045_v4 = vpop.eup %2044  ;;  %v1551_v13 = vpack.c.bf16 %v1502_v36, %v1500_v28  ;;  %2056 = vtanh.f32 %v1587_v11 }
 0x22e   :  { %v2047_v22 = vpop.eup %2046  ;;  %2058 = vtanh.f32 %v1585_v3 }
 0x22f   :  { %v2049_v57 = vpop.eup %2048  ;;  %v1574_v5 = vunpack.c.l.bf16 %v1551_v13  ;;  %v1575_v14 = vunpack.c.h.bf16 %v1551_v13  ;;  %v1639_v25 = vpack.c.bf16 %v2047_v22, %v2045_v4  ;;  %v1562_v22 = vunpack.c.l.bf16 %v2961_v45 }
 0x230   :  { %v2051_v26 = vpop.eup %2050 }
 0x231   :  { %2060 = vtanh.f32 %v1574_v5  ;;  %1665 = vmatpush.bf16.msrb.mxu3 %v1639_v25  ;;  %v2053_v35 = vpop.eup %2052  ;;  %v1638_v34 = vpack.c.bf16 %v2051_v26, %v2049_v57  ;;  %v1563_v57 = vunpack.c.h.bf16 %v2961_v45  ;;  %v1560_v25 = vunpack.c.l.bf16 %v2957_v10  ;;  %v1951_v45 = vld [vmem:[%s3059_s7 + $0x4] sm:$0xf] }
 0x232   :  { %2062 = vtanh.f32 %v1575_v14  ;;  %v1504_v7 = vpop.f32.mrf.mxu1  ;;  %v2055_v46 = vpop.eup %2054 }
 0x233   :  { %2064 = vtanh.f32 %v1572_v30  ;;  %v2057_v8 = vpop.eup %2056  ;;  %v1417_v18 = vpop.f32.mrf.mxu0  ;;  %v1505_v48 = vadd.f32 %v1504_v7, %v1416_v55  ;;  %v1913_v7 = vld [vmem:[%s3059_s7 + $0x8] sm:$0xf0] }
 0x234   :  { %2066 = vtanh.f32 %v1573_v6  ;;  %v2059_v21 = vpop.eup %2058  ;;  %v1637_v56 = vpack.c.bf16 %v2057_v8, %v2055_v46  ;;  %v1418_v58 = vadd.f32 %v1417_v18, %v1134_v37  ;;  %v1952_v18 = vld [vmem:[%s3059_s7 + $0x4] sm:$0xf0] }
 0x235   :  { %2068 = vtanh.f32 %v1582_v62  ;;  %1666 = vmatpush.bf16.msrb.mxu3 %v1638_v34  ;;  %v1636_v40 = vpack.c.bf16 %v2059_v21, %v2053_v35  ;;  %v1561_v62 = vunpack.c.h.bf16 %v2957_v10 }
 0x236   :  { %2070 = vtanh.f32 %v1583_v50 }
 0x237   :  { %v2061_v52 = vpop.eup %2060  ;;  %2072 = vtanh.f32 %v1570_v1  ;;  %v1916_v1 = vor.u32 %v1951_v45, %v1913_v7 }
 0x238   :  { %v2063_v38 = vpop.eup %2062  ;;  %2074 = vtanh.f32 %v1571_v41 }
 0x239   :  { %v2065_v59 = vpop.eup %2064  ;;  %2076 = vtanh.f32 %v1580_v9  ;;  %1667 = vmatpush.bf16.msrb.mxu3 %v1637_v56  ;;  %v1631_v0 = vpack.c.bf16 %v2063_v38, %v2061_v52  ;;  %v1640_v56 = vstv %s3060_s8 }
 0x23a   :  { %v2067_v32 = vpop.eup %2066  ;;  %2078 = vtanh.f32 %v1581_v16  ;;  %v1506_v29 = vpop.f32.mrf.mxu1  ;;  %v1911_v16 = vld [vmem:[%s3059_s7] sm:$0xf] }
 0x23b   :  { %v2069_v12 = vpop.eup %2068  ;;  %2080 = vtanh.f32 %v1568_v15  ;;  %v1507_v53 = vadd.f32 %v1506_v29, %v1418_v58  ;;  %1651 = vmatpush.bf16.msrb.mxu2 %v1631_v0  ;;  %v1630_v17 = vpack.c.bf16 %v2067_v32, %v2065_v59  ;;  %v1912_v15 = vor.u32 %v1952_v18, %v1911_v16 }
 0x23c   :  { %v2071_v47 = vpop.eup %2070  ;;  %2082 = vtanh.f32 %v1569_v19 }
 0x23d   :  { %v2073_v63 = vpop.eup %2072  ;;  %2084 = vtanh.f32 %v1578_v23  ;;  %v1552_v11 = vpack.c.bf16 %v1507_v53, %v1505_v48  ;;  %1668 = vmatpush.bf16.msrb.mxu3 %v1636_v40  ;;  %v1635_v3 = vpack.c.bf16 %v2071_v47, %v2069_v12  ;;  %v3031_v23 = vld [vmem:[%s3054_s2] ss:$0 sm:$0xff] }
 0x23e   :  { %v2075_v24 = vpop.eup %2074  ;;  %2086 = vtanh.f32 %v1579_v44 }
 0x23f   :  { %v2077_v31 = vpop.eup %2076  ;;  %2088 = vtanh.f32 %v1566_v51  ;;  %v1576_v28 = vunpack.c.l.bf16 %v1552_v11  ;;  %v1577_v36 = vunpack.c.h.bf16 %v1552_v11  ;;  %1652 = vmatpush.bf16.msrb.mxu2 %v1630_v17  ;;  %v1629_v60 = vpack.c.bf16 %v2075_v24, %v2073_v63 }
 0x240   :  { %v2079_v43 = vpop.eup %2078  ;;  %2090 = vtanh.f32 %v1567_v54 }
 0x241   :  { %v2081_v27 = vpop.eup %2080  ;;  %2092 = vtanh.f32 %v1576_v28  ;;  %1669 = vmatpush.bf16.msrb.mxu3 %v1635_v3  ;;  %v1634_v20 = vpack.c.bf16 %v2079_v43, %v2077_v31  ;;  %v1979_v31 = vld [vmem:[%s3053_s1] ss:$0 sm:$0xff]  ;;  %s2176_s1 = smov [#allocation3]  }
 0x242   :  { %v2083_v4 = vpop.eup %2082  ;;  %2094 = vtanh.f32 %v1577_v36  ;;  %s1749_s23 = sshll.u32 %s2176_s1, 4  ;;  %s1750_s23 = int_to_ptr.vmem [resolvable:$true] %s1749_s23 }
 0x243   :  { %v2085_v13 = vpop.eup %2084  ;;  %2096 = vtanh.f32 %v1564_v33  ;;  %1653 = vmatpush.bf16.msrb.mxu2 %v1629_v60  ;;  %v1628_v39 = vpack.c.bf16 %v2083_v4, %v2081_v27 }
 0x244   :  { %v2087_v42 = vpop.eup %2086  ;;  %2098 = vtanh.f32 %v1565_v49 }
 0x245   :  { %v2089_v30 = vpop.eup %2088  ;;  %1670 = vmatpush.bf16.msrb.mxu3 %v1634_v20  ;;  %2100 = vtanh.f32 %v1562_v22  ;;  %v1633_v26 = vpack.c.bf16 %v2087_v42, %v2085_v13  ;;  %v2120_v20 = vld [vmem:[%s3052_s0] sm:$0xff] }
 0x246   :  { %v2091_v5 = vpop.eup %2090  ;;  %2102 = vtanh.f32 %v1563_v57 }
 0x247   :  { %v2093_v14 = vpop.eup %2092  ;;  %1654 = vmatpush.bf16.msrb.mxu2 %v1628_v39  ;;  %v1627_v50 = vpack.c.bf16 %v2091_v5, %v2089_v30  ;;  %2104 = vtanh.f32 %v1560_v25 }
 0x248   :  { %v2095_v6 = vpop.eup %2094  ;;  %2106 = vtanh.f32 %v1561_v62 }
 0x249   :  { %v2097_v35 = vpop.eup %2096  ;;  %1671 = vmatpush.bf16.msrb.mxu3 %v1633_v26  ;;  %v1632_v2 = vpack.c.bf16 %v2095_v6, %v2093_v14 }
 0x24a   :  { %v2099_v46 = vpop.eup %2098 }
 0x24b   :  { %1655 = vmatpush.bf16.msrb.mxu2 %v1627_v50  ;;  %v2101_v34 = vpop.eup %2100  ;;  %v1626_v10 = vpack.c.bf16 %v2099_v46, %v2097_v35  ;;  %v2121_v35 = vld [vmem:[%s3052_s0 + $0x8] sm:$0xff]  ;;  %s1764_s0 = sshll.u32 %s3062_s10, 4  ;;  %s1765_s0 = int_to_ptr.hbm [resolvable:$true] %s1764_s0 }
 0x24c   :  { %v2103_v8 = vpop.eup %2102 }
 0x24d   :  { %1672 = vmatpush.bf16.msrb.mxu3 %v1632_v2  ;;  %v2105_v41 = vpop.eup %2104  ;;  %v1625_v9 = vpack.c.bf16 %v2103_v8, %v2101_v34 }
 0x24e   :  { %v2107_v21 = vpop.eup %2106 }
 0x24f   :  { %1656 = vmatpush.bf16.msrb.mxu2 %v1626_v10  ;;  %v1624_v52 = vpack.c.bf16 %v2107_v21, %v2105_v41 }
 0x250   :  { %1673 = vmatmul.bf16.vlgmr.msrb.gmra.mxu3 %v1916_v1 }
 0x253   :  { %1657 = vmatpush.bf16.msrb.mxu2 %v1625_v9 }
 0x257   :  { %1658 = vmatpush.bf16.msrb.mxu2 %v1624_v52 }
 0x25a   :  { %1659 = vmatmul.bf16.vlgmr.msrb.gmra.mxu2 %v1912_v15 }
 0x2d3   :  { %v1674_v37 = vpop.f32.mrf.mxu3 }
 0x2db   :  { %v1676_v32 = vpop.f32.mrf.mxu3 }
 0x2dd   :  { %v1660_v38 = vpop.f32.mrf.mxu2 }
 0x2de   :  { %v1661_v61 = vadd.f32 %v1660_v38, %v1640_v56 }
 0x2e0   :  { %v1675_v19 = vadd.f32 %v1674_v37, %v1661_v61 }
 0x2e2   :  { %v1682_v59 = vmul.f32 %v3031_v23, %v1675_v19 }
 0x2e4   :  { %v1917_v55 = vmul.f32 -1.442695, %v1682_v59 }
 0x2e5   :  { %v1662_v58 = vpop.f32.mrf.mxu2 }
 0x2e6   :  { %2108 = vpow2.f32 %v1917_v55  ;;  %v1663_v0 = vadd.f32 %v1662_v58, %v1640_v56 }
 0x2e8   :  { %v1677_v44 = vadd.f32 %v1676_v32, %v1663_v0 }
 0x2ea   :  { %v1683_v51 = vmul.f32 %v3031_v23, %v1677_v44 }
 0x2ec   :  { %v2109_v29 = vpop.eup %2108  ;;  %v1918_v12 = vmul.f32 -1.442695, %v1683_v51 }
 0x2ed   :  { %v1690_v48 = vadd.f32 1.0, %v2109_v29 }
 0x2ee   :  { %2110 = vpow2.f32 %v1918_v12 }
 0x2ef   :  { %2112 = vrcp.f32 %v1690_v48  ;;  %v1703_v11 = vand.u32 2147483648, %v1690_v48  ;;  %v1701_v24 = vand.u32 2147483647, %v1690_v48  ;;  %vm1697_vm1 = vweird.f32 %v1690_v48 }
 0x2f1   :  { %v1704_v36 = vor.u32 1.1754944e-38, %v1703_v11  ;;  %vm1702_vm3 = vcmp.eq.f32.partialorder %v1701_v24, 8.507059e+37 }
 0x2f4   :  { %v2111_v53 = vpop.eup %2110 }
 0x2f5   :  { %v2113_v40 = vpop.eup %2112  ;;  %v1691_v47 = vadd.f32 1.0, %v2111_v53 }
 0x2f6   :  { %v1693_v54 = vmul.f32 %v2113_v40, %v1690_v48  ;;  %vm1698_vm0 = vweird.f32 %v2113_v40 }
 0x2f7   :  { %2114 = vrcp.f32 %v1691_v47  ;;  %vm1699_vm2 = vmor %vm1697_vm1, %vm1698_vm0  ;;  %v1716_v4 = vand.u32 2147483647, %v1691_v47  ;;  %v1718_v13 = vand.u32 2147483648, %v1691_v47  ;;  %vm1712_vm5 = vweird.f32 %v1691_v47 }
 0x2f8   :  { %v1694_v63 = vsub.f32 1.0, %v1693_v54 }
 0x2f9   :  { %v1719_v14 = vor.u32 1.1754944e-38, %v1718_v13  ;;  %vm1717_vm7 = vcmp.eq.f32.partialorder %v1716_v4, 8.507059e+37 }
 0x2fa   :  { %v1695_v17 = vmul.f32 %v2113_v40, %v1694_v63 }
 0x2fc   :  { %v1696_v33 = vadd.f32 %v2113_v40, %v1695_v17 }
 0x2fd   :  { %v2115_v28 = vpop.eup %2114 }
 0x2fe   :  { %v1708_v3 = vmul.f32 %v2115_v28, %v1691_v47  ;;  %v1700_v43 = vsel %vm1699_vm2, %v2113_v40, %v1696_v33  ;;  %vm1713_vm4 = vweird.f32 %v2115_v28 }
 0x2ff   :  { %v1705_v49 = vsel %vm1702_vm3, %v1704_v36, %v1700_v43  ;;  %vm1714_vm6 = vmor %vm1712_vm5, %vm1713_vm4 }
 0x300   :  { %v1709_v27 = vsub.f32 1.0, %v1708_v3  ;;  %v1725_v60 = vmul.f32 %v1979_v31, %v1705_v49  ;;  %v1733_v30 = vsub.f32 1.0, %v1705_v49 }
 0x302   :  { %v1710_v22 = vmul.f32 %v2115_v28, %v1709_v27  ;;  %v1727_v42 = vadd.f32 %v2120_v20, %v1725_v60  ;;  %v1731_v57 = vmul.f32 %v3031_v23, %v1725_v60 }
 0x304   :  { %v1711_v39 = vadd.f32 %v2115_v28, %v1710_v22  ;;  %1729 = vst [vmem:[#allocation3] sm:$0xff] %v1727_v42  ;;  %v1735_v5 = vmul.f32 %v1733_v30, %v1731_v57 }
 0x306   :  { %v1715_v25 = vsel %vm1714_vm6, %v2115_v28, %v1711_v39  ;;  %v1737_v26 = vadd.f32 1.0, %v1735_v5 }
 0x307   :  { %v1720_v6 = vsel %vm1717_vm7, %v1719_v14, %v1715_v25 }
 0x308   :  { %v1726_v62 = vmul.f32 %v1979_v31, %v1720_v6  ;;  %2116 = vlog2.f32 %v1737_v26  ;;  %v1734_v7 = vsub.f32 1.0, %v1720_v6 }
 0x30a   :  { %v1728_v50 = vadd.f32 %v2121_v35, %v1726_v62  ;;  %v1732_v45 = vmul.f32 %v3031_v23, %v1726_v62 }
 0x30c   :  { %1730 = vst [vmem:[#allocation3 + $0x8] sm:$0xff] %v1728_v50  ;;  %v1736_v46 = vmul.f32 %v1734_v7, %v1732_v45 }
 0x30d   :  { %1757 = dma.vmem_to_hbm [thread:$0]  %s1750_s23, 256, %s1752_s26, [#allocation4], %s2177_s28, %s2177_s28, %s2178_s29  }
 0x30e   :  { %v2117_v2 = vpop.eup %2116  ;;  %v1738_v1 = vadd.f32 1.0, %v1736_v46 }
 0x30f   :  { %v1740_v34 = vmul.f32 0.6931472, %v2117_v2 }
 0x310   :  { %2118 = vlog2.f32 %v1738_v1 }
 0x311   :  { %1743 = vst [vmem:[#allocation5] sm:$0xff] %v1740_v34 }
 0x316   :  { %v2119_v10 = vpop.eup %2118 }
 0x317   :  { %v1742_v8 = vmul.f32 0.6931472, %v2119_v10 }
 0x319   :  { %1744 = vst [vmem:[#allocation5 + $0x8] sm:$0xff] %v1742_v8 }
 0x31a   :  { %1770 = dma.vmem_to_hbm [thread:$0]  %s1763_s30, 256, %s1765_s0, [#allocation6], %s2177_s28, %s2177_s28, %s2178_s29  }
 0x31b   :  { %2170 = dma.done.wait [#allocation4], 256  }
 0x31c   :  { %2171 = vsyncadd [#allocation4], 4294967040 }
 0x31d   :  { %2172 = dma.done.wait [#allocation6], 256  }
 0x31e   :  { %2173 = vsyncadd [#allocation6], 4294967040 }
 0x31f   :  { %1779 = vsyncpa [#allocation4], 1 }
 0x320   :  { %1780 = vsyncpa [#allocation6], 1 }

</bundles_post_ra>
